<compile_context>
chip_gen: v7x
topology: tpu7x:2x2x1
jax: 0.10.0
libtpu: 0.0.40
codegen_flags: <defaults>
</compile_context>

<pallas_src>
import functools
import math

import jax
import jax.numpy as jnp
from jax import lax
from jax.experimental import pallas as pl
from jax.experimental.pallas import tpu as pltpu

N_EMBD = 384       # from the module
BLOCK_SIZE = 256   # max sequence length (tril buffer size)
LANE = 128         # TPU lane width


def _head_kernel(x_ref, w_ref, o_ref, *, head_size):
    """One grid step = Bb batch rows; everything fits comfortably in VMEM.

    x_ref : (Bb, T, C) fp32
    w_ref : (C, 3*h_pad) bf16, stacked zero-padded [Wk | Wq | Wv]
    o_ref : (Bb, T, h_pad)
    """
    Bb, T, C = x_ref.shape
    h_pad = w_ref.shape[1] // 3

    # Fused K/Q/V projection: one (Bb*T, C) x (C, 3*h_pad) bf16 MXU matmul,
    # fp32 accumulation.  Merging the batch rows grows the M dimension.
    x2d = x_ref[...].reshape(Bb * T, C).astype(jnp.bfloat16)
    kqv = jnp.dot(x2d, w_ref[...], preferred_element_type=jnp.float32)

    # Lane-aligned (multiple-of-128) slices; padded columns are zero.
    k = kqv[:, 0:h_pad]
    q = kqv[:, h_pad:2 * h_pad]
    v = kqv[:, 2 * h_pad:3 * h_pad]

    # Fold 1/sqrt(head_size) into q: T*H multiplies instead of T*T on scores.
    q = q * jnp.float32(head_size ** -0.5)

    k3 = k.reshape(Bb, T, h_pad).astype(jnp.bfloat16)
    q3 = q.reshape(Bb, T, h_pad).astype(jnp.bfloat16)
    v3 = v.reshape(Bb, T, h_pad).astype(jnp.bfloat16)

    # Scores: contract the last dim of q and k directly (no explicit k.T,
    # so no XLU transpose / extra VMEM temporary).  Padded lanes contribute 0.
    s = jnp.einsum('bqd,bkd->bqk', q3, k3,
                   preferred_element_type=jnp.float32)          # (Bb, T, T) fp32

    # Causal mask == tril[:T, :T]; masked positions -> -inf.
    row = lax.broadcasted_iota(jnp.int32, (Bb, T, T), 1)
    col = lax.broadcasted_iota(jnp.int32, (Bb, T, T), 2)
    s = jnp.where(col <= row, s, -jnp.inf)

    # Numerically stable softmax over the last axis, fp32 throughout.
    s = s - jnp.max(s, axis=-1, keepdims=True)
    p = jnp.exp(s)
    p = p * pl.reciprocal(jnp.sum(p, axis=-1, keepdims=True), approx=True)

    # Dropout: identity (eval mode).

    # Weighted aggregation of values: bf16 operands, fp32 accumulation.
    out = jnp.einsum('bqk,bkd->bqd', p.astype(jnp.bfloat16), v3,
                     preferred_element_type=jnp.float32)        # (Bb, T, h_pad)
    o_ref[...] = out.astype(o_ref.dtype)


def head_forward(x, w_key, w_query, w_value, *, batch_block=None):
    """x: (B, T, C) float32; w_*: (C, H) float32. Returns (B, T, H)."""
    B, T, C = x.shape
    H = w_key.shape[-1]
    assert C == w_key.shape[0] == w_query.shape[0] == w_value.shape[0]
    assert T <= BLOCK_SIZE
    assert T % 8 == 0, "T must be a multiple of 8 for efficient TPU layouts"

    # Merge batch rows per grid step to fill the MXU M dimension, but keep the
    # grid length >= 2 when possible so v7x can shard steps across its 2 TCs.
    if batch_block is None:
        batch_block = 1
        for bb in (8, 4, 2):
            if B % bb == 0 and (B // bb) >= 2:
                batch_block = bb
                break
    assert B % batch_block == 0

    # Pad each head's weight to a lane-dense 128-wide slab and stack into one
    # (C, 3*h_pad) matrix (one-time, wrapper-side).  Cast to bf16 once here so
    # the kernel DMAs half the weight bytes and skips an in-kernel cast.
    h_pad = ((H + LANE - 1) // LANE) * LANE
    def _pad(w):
        return jnp.pad(w, ((0, 0), (0, h_pad - H)))
    w_stacked = jnp.concatenate([_pad(w_key), _pad(w_query), _pad(w_value)],
                                axis=1).astype(jnp.bfloat16)

    kernel = functools.partial(_head_kernel, head_size=H)

    out_padded = pl.pallas_call(
        kernel,
        out_shape=jax.ShapeDtypeStruct((B, T, h_pad), x.dtype),
        grid_spec=pltpu.PrefetchScalarGridSpec(
            num_scalar_prefetch=0,
            grid=(B // batch_block,),
            in_specs=[
                pl.BlockSpec((batch_block, T, C), lambda b: (b, 0, 0)),  # x rows
                pl.BlockSpec((C, 3 * h_pad), lambda b: (0, 0)),          # fused W
            ],
            out_specs=pl.BlockSpec((batch_block, T, h_pad), lambda b: (b, 0, 0)),
        ),
        compiler_params=pltpu.CompilerParams(
            dimension_semantics=("parallel",),
        ),
    )(x, w_stacked)

    # Drop the zero padding (outside the kernel so in-kernel stores stay
    # lane-dense).
    return out_padded[..., :H] if h_pad != H else out_padded


def _reference(x, w_key, w_query, w_value):
    """Pure-JAX fp32 reference mirroring the PyTorch forward (eval mode)."""
    B, T, C = x.shape
    k = x @ w_key
    q = x @ w_query
    v = x @ w_value
    weights = (q @ jnp.swapaxes(k, -2, -1)) * (k.shape[-1] ** -0.5)
    tril = jnp.tril(jnp.ones((T, T), dtype=bool))
    weights = jnp.where(tril, weights, -jnp.inf)
    weights = jax.nn.softmax(weights, axis=-1)
    return weights @ v


if __name__ == "__main__":
    # Small-but-consistent shapes: C must be n_embd=384, T <= block_size=256.
    B, T, C = 4, 128, N_EMBD
    head_size = 64

    key = jax.random.PRNGKey(0)
    kx, kk, kq, kv = jax.random.split(key, 4)

    x = jax.random.normal(kx, (B, T, C), dtype=jnp.float32)
    # Deterministic init mimicking nn.Linear's U(-1/sqrt(in), 1/sqrt(in)).
    bound = 1.0 / math.sqrt(C)
    w_key = jax.random.uniform(kk, (C, head_size), jnp.float32, -bound, bound)
    w_query = jax.random.uniform(kq, (C, head_size), jnp.float32, -bound, bound)
    w_value = jax.random.uniform(kv, (C, head_size), jnp.float32, -bound, bound)

    out = head_forward(x, w_key, w_query, w_value)
    out = jax.block_until_ready(out)

    ref = _reference(x, w_key, w_query, w_value)
    assert out.shape == (B, T, head_size)
    # bf16 MXU operands + approx reciprocal => tolerance loosened vs fp32.
    max_err = float(jnp.max(jnp.abs(out - ref)))
    assert jnp.allclose(out, ref, atol=3e-2, rtol=3e-2), (
        f"mismatch vs reference (max abs err {max_err})")

    print("KERNEL_OK")
</pallas_src>

<mosaic_0001>
module attributes {stable_mosaic.version = 11 : i64} {
  func.func @_head_kernel(%arg0: i32, %arg1: memref<2x128x384xf32, #tpu.memory_space<vmem>>, %arg2: memref<384x384xbf16, #tpu.memory_space<vmem>>, %arg3: memref<2x128x128xf32, #tpu.memory_space<vmem>>) attributes {dimension_semantics = [#tpu.dimension_semantics<parallel>], iteration_bounds = array<i64: 2>, scalar_prefetch = 0 : i64, scratch_operands = 0 : i64, tpu.core_type = #tpu.core_type<tc>, window_params = [{transform_indices = @transform_0, window_bounds = array<i64: 2, 128, 384>}, {pipeline_mode = #tpu.pipeline_mode<synchronous>, transform_indices = @transform_1, window_bounds = array<i64: 384, 384>}, {transform_indices = @transform_2, window_bounds = array<i64: 2, 128, 128>}]} {
    %c0 = arith.constant 0 : index
    %c0_0 = arith.constant 0 : index
    %c0_1 = arith.constant 0 : index
    %0 = vector.load %arg1[%c0, %c0_0, %c0_1] : memref<2x128x384xf32, #tpu.memory_space<vmem>>, vector<2x128x384xf32>
    %1 = vector.shape_cast %0 : vector<2x128x384xf32> to vector<256x384xf32>
    %2 = arith.truncf %1 : vector<256x384xf32> to vector<256x384xbf16>
    %c0_2 = arith.constant 0 : index
    %c0_3 = arith.constant 0 : index
    %3 = vector.load %arg2[%c0_2, %c0_3] : memref<384x384xbf16, #tpu.memory_space<vmem>>, vector<384x384xbf16>
    %cst = arith.constant dense<0.000000e+00> : vector<256x384xf32>
    %4 = tpu.matmul %2, %3, %cst {dimension_numbers = #tpu.dot_dimension_numbers<[1], [0], [0], [1], [0, 0, 1, 1], [], []>} : vector<256x384xbf16>, vector<384x384xbf16>, vector<256x384xf32> -> vector<256x384xf32>
    %5 = vector.extract_strided_slice %4 {offsets = [0, 0], sizes = [256, 128], strides = [1, 1]} : vector<256x384xf32> to vector<256x128xf32>
    %6 = vector.extract_strided_slice %4 {offsets = [0, 128], sizes = [256, 128], strides = [1, 1]} : vector<256x384xf32> to vector<256x128xf32>
    %7 = vector.extract_strided_slice %4 {offsets = [0, 256], sizes = [256, 128], strides = [1, 1]} : vector<256x384xf32> to vector<256x128xf32>
    %cst_4 = arith.constant 1.250000e-01 : f32
    %8 = vector.broadcast %cst_4 : f32 to vector<256x128xf32>
    %9 = arith.mulf %6, %8 : vector<256x128xf32>
    %10 = vector.shape_cast %5 : vector<256x128xf32> to vector<2x128x128xf32>
    %11 = arith.truncf %10 : vector<2x128x128xf32> to vector<2x128x128xbf16>
    %12 = vector.shape_cast %9 : vector<256x128xf32> to vector<2x128x128xf32>
    %13 = arith.truncf %12 : vector<2x128x128xf32> to vector<2x128x128xbf16>
    %14 = vector.shape_cast %7 : vector<256x128xf32> to vector<2x128x128xf32>
    %15 = arith.truncf %14 : vector<2x128x128xf32> to vector<2x128x128xbf16>
    "tpu.trace_start"() <{level = 10 : i32, message = "bqd,bkd->bqk"}> : () -> ()
    %cst_5 = arith.constant dense<0.000000e+00> : vector<2x128x128xf32>
    %16 = tpu.matmul %13, %11, %cst_5 {dimension_numbers = #tpu.dot_dimension_numbers<[2], [2], [1], [1], [0, 0, 0, 1, 1, 1], [0], [0]>} : vector<2x128x128xbf16>, vector<2x128x128xbf16>, vector<2x128x128xf32> -> vector<2x128x128xf32>
    "tpu.trace_stop"() : () -> ()
    %17 = tpu.iota {dimensions = array<i32: 1>} : vector<2x128x128xi32>
    %18 = tpu.iota {dimensions = array<i32: 2>} : vector<2x128x128xi32>
    %19 = arith.cmpi sle, %18, %17 : vector<2x128x128xi32>
    %cst_6 = arith.constant 0xFF800000 : f32
    %20 = vector.broadcast %cst_6 : f32 to vector<2x128x128xf32>
    %21 = arith.select %19, %16, %20 : vector<2x128x128xi1>, vector<2x128x128xf32>
    %cst_7 = arith.constant dense<0xFF800000> : vector<2x128xf32>
    %22 = vector.multi_reduction <maximumf>, %21, %cst_7 [2] : vector<2x128x128xf32> to vector<2x128xf32>
    %23 = vector.shape_cast %22 : vector<2x128xf32> to vector<2x128x1xf32>
    %24 = vector.broadcast %23 : vector<2x128x1xf32> to vector<2x128x128xf32>
    %25 = arith.subf %21, %24 : vector<2x128x128xf32>
    %26 = math.exp %25 : vector<2x128x128xf32>
    %cst_8 = arith.constant dense<0.000000e+00> : vector<2x128xf32>
    %27 = vector.multi_reduction <add>, %26, %cst_8 [2] : vector<2x128x128xf32> to vector<2x128xf32>
    %28 = vector.shape_cast %27 : vector<2x128xf32> to vector<2x128x1xf32>
    %29 = tpu.reciprocal %28 {approx = true} : vector<2x128x1xf32> -> vector<2x128x1xf32>
    %30 = vector.broadcast %29 : vector<2x128x1xf32> to vector<2x128x128xf32>
    %31 = arith.mulf %26, %30 : vector<2x128x128xf32>
    %32 = arith.truncf %31 : vector<2x128x128xf32> to vector<2x128x128xbf16>
    "tpu.trace_start"() <{level = 10 : i32, message = "bqk,bkd->bqd"}> : () -> ()
    %cst_9 = arith.constant dense<0.000000e+00> : vector<2x128x128xf32>
    %33 = tpu.matmul %32, %15, %cst_9 {dimension_numbers = #tpu.dot_dimension_numbers<[2], [1], [1], [2], [0, 0, 0, 1, 1, 2], [0], [0]>} : vector<2x128x128xbf16>, vector<2x128x128xbf16>, vector<2x128x128xf32> -> vector<2x128x128xf32>
    "tpu.trace_stop"() : () -> ()
    %c0_10 = arith.constant 0 : index
    %c0_11 = arith.constant 0 : index
    %c0_12 = arith.constant 0 : index
    %34 = vector.load %arg3[%c0_10, %c0_11, %c0_12] : memref<2x128x128xf32, #tpu.memory_space<vmem>>, vector<2x128x128xf32>
    tpu.vector_store %arg3[%c0_10, %c0_11, %c0_12], %33 {strides = array<i32>} : memref<2x128x128xf32, #tpu.memory_space<vmem>>, vector<2x128x128xf32>,
    return
  }
  func.func @transform_0(%arg0: i32) -> (i32, i32, i32) {
    %c0_i32 = arith.constant 0 : i32
    %c0_i32_0 = arith.constant 0 : i32
    %c0_i32_1 = arith.constant 0 : i32
    return %arg0, %c0_i32, %c0_i32_0 : i32, i32, i32
  }
  func.func @transform_1(%arg0: i32) -> (i32, i32) {
    %c0_i32 = arith.constant 0 : i32
    %c0_i32_0 = arith.constant 0 : i32
    %c0_i32_1 = arith.constant 0 : i32
    return %c0_i32, %c0_i32_0 : i32, i32
  }
  func.func @transform_2(%arg0: i32) -> (i32, i32, i32) {
    %c0_i32 = arith.constant 0 : i32
    %c0_i32_0 = arith.constant 0 : i32
    %c0_i32_1 = arith.constant 0 : i32
    return %arg0, %c0_i32, %c0_i32_0 : i32, i32, i32
  }
}

</mosaic_0001>

<bundles_post_ra>
// kernel: tpu_custom_call.1
= control target key start
LH: loop header
LB: loop body
LE: loop exit
PB: predicated region body
PF: predicated region fallthrough
CT: control target
= control target key end

     0   :  { %7 = vsyncpa [#allocation3], 0  ;;  %s4423_s0 = inlined_call_operand.hbm [shape: f32[4,128,384], index: 0, kind: input, shape index: {}]   ;;  %s4424_s1 = inlined_call_operand.hbm [shape: bf16[384,384], index: 1, kind: input, shape index: {}]   ;;  %s4425_s2 = inlined_call_operand.hbm [shape: f32[4,128,128], index: 2, kind: output, shape index: {}]  }
   0x1   :  { %9 = vsyncpa [#allocation3 + $0x1], 0 }
   0x2   :  { %10 = vsyncpa [#allocation6], 0 }
   0x3   :  { %11 = vsyncpa [#allocation4], 0 }
   0x4   :  { %13 = vsyncpa [#allocation4 + $0x1], 0  ;;  %s3458_s9 = smov 0   ;;  %s3460_s10 = smov 0  }
   0x5   :  { %s3462_s11 = smov 0   ;;  %s3464_s12 = smov 0  }
   0x6 LB: > { %s3479_s13 = sadd.s32 4294967295, %s3431_s12   ;;  %s2482_s14 = sadd.s32 4294967294, %s3431_s12   ;;  %s3431_s12 = sphi %s3464_s12, %s4445_s12   ;;  %s3427_s11 = sphi %s3462_s11, %s4444_s11   ;;  %s3423_s10 = sphi %s3460_s10, %s4443_s10   ;;  %s3419_s9 = sphi %s3458_s9, %s4442_s9  }
   0x7   : > { %p39_p0 = scmp.ne.s32.totalorder %s3423_s10, %s3419_s9  ;;  %p4426_p1 = scmp.eq.s32.totalorder %s3479_s13, 0 }
   0x8   : > { %p90_p3 = scmp.eq.s32.totalorder %s2482_s14, 1  ;;  %p2483_p5 = scmp.ge.s32.totalorder %s3431_s12, 1 }
   0x9   : > { %p3488_p4 = por %p4426_p1, %p39_p0  ;;  %p97_p7 = scmp.lt.s32.totalorder %s3431_s12, 3 }
   0xa   : > { %p3493_p6 = por %p90_p3, %p39_p0  ;;  %s3433_s18 = smov [#allocation5]  }
   0xb   : > { %s4429_s15 = scalar_select %p3488_p4, 1, 0 }
   0xc   : > { %s4430_s16 = scalar_select %p3493_p6, 1, 0 }
   0xd   : > { %p3498_p8 = pnand %p2483_p5, %p97_p7  ;;  %s109_s19 = sshll.u32 %s3433_s18, 4  ;;  %s3502_s19 = int_to_ptr.vmem [resolvable:$true] %s109_s19 }
   0xe   : > { %s3514_s21 = sadd.s32 1, %s3431_s12   ;;  %s26_s22 = sadd.s32 1, %s3427_s11 }
   0xf   : > { %s4431_s17 = scalar_select %p3498_p8, 1, 0 }
  0x10   : > { %p3023_p9 = pneg %p3498_p8  ;;  %s23_s23 = ssub.s32 %s3431_s12, %s3514_s21 }
  0x11   : > { %s3303_s26 = scalar_lea.hbm %s4424_s1, 9216 }
  0x12   : > { %p3509_p11 = pnand %p3023_p9, %p4426_p1  ;;  %p3304_p12 = scmp.ne.s32.totalorder %s4424_s1, %s3303_s26 }
  0x13   : > { %p3310_p5 = scmp.lt.u32.totalorder %s3303_s26, %s4424_s1 }
  0x14   : > { %p3305_p13 = pneg %p3509_p11 }
  0x16   : > { %p3306_p0 = pnand %p3305_p13, %p3304_p12 }
  0x18   : > { %p3307_p3 = pneg %p3306_p0 }
  0x1a   : > { %p3312_p7 = pnand %p3310_p5, %p3307_p3 }
  0x1c   : > { %3315 = shalt.err (!%p3312_p7)
}
  0x1d   : > { %s3316_s3 = scalar_lea.vmem %s3502_s19, 9216  ;;  %p3324_p2 = scmp.lt.s32.totalorder %s3502_s19, %s3502_s19 }
  0x1e   : > { %p3317_p9 = scmp.ne.s32.totalorder %s3502_s19, %s3316_s3  ;;  %p3325_p6 = scmp.lt.s32.totalorder %s3316_s3, %s3316_s3 }
  0x20   : > { %p3319_p10 = pnand %p3317_p9, %p3305_p13  ;;  %p3326_p4 = por %p3325_p6, %p3324_p2 }
  0x22   : > { %p3320_p1 = pneg %p3319_p10 }
  0x24   : > { %p3327_p8 = pnand %p3326_p4, %p3320_p1 }
  0x26   : > { %3330 = shalt.err (!%p3327_p8)
}
  0x27   : > { %s3434_s4 = smov 192   ;;  %s3435_s5 = smov 12  }
  0x28   : > { %3026 = dma.hbm_to_vmem [thread:$0]  (!%p3509_p11), %s4424_s1, 9216, %s3502_s19, [#allocation6], %s3434_s4, %s3434_s4, %s3435_s5  }
  0x29   : > { %p24_p2 = scmp.eq.s32.totalorder %s23_s23, 0  ;;  %p33_p1 = scmp.ne.s32.totalorder %s3427_s11, %s3423_s10 }
  0x2a   : > { %p34_p4 = scmp.eq.s32.totalorder %s3431_s12, 0  ;;  %p3036_p6 = scmp.lt.s32.totalorder %s3431_s12, 2 }
  0x2b   : > { %s3545_s8 = scalar_select %p24_p2, %s3427_s11, %s26_s22  }
  0x2c   : > { %p35_p8 = por %p34_p4, %p33_p1  ;;  %p4433_p10 = scmp.eq.s32.totalorder %s3479_s13, 1 }
  0x2d   : > { %s123_s18 = sand.u32 1, %s3427_s11   ;;  %s3013_s24 = smul.u32 12288, %s3431_s12 }
  0x2e   : > { %p3549_p12 = por %p4433_p10, %p33_p1  ;;  %s3012_s25 = smul.u32 768, %s123_s18 }
  0x2f   : > { %s3558_s27 = scalar_lea.hbm %s4423_s0, %s3013_s24  ;;  %p3560_p11 = pnand %p3036_p6, %p35_p8 }
  0x30   : > { %s127_s22 = scalar_lea.vmem [#allocation2], %s3012_s25  ;;  %s3566_s28 = scalar_lea.sflag [#allocation3], %s123_s18 }
  0x31   : > { %s135_s23 = sshll.u32 %s127_s22, 4  ;;  %s3331_s29 = scalar_lea.hbm %s3558_s27, 12288  ;;  %s3564_s23 = int_to_ptr.vmem [resolvable:$true] %s135_s23 }
  0x32   : > { %p3332_p13 = scmp.ne.s32.totalorder %s3558_s27, %s3331_s29  ;;  %p3333_p0 = pneg %p3560_p11 }
  0x33   : > { %s3336_s4 = scalar_lea.hbm %s4423_s0, 24576  ;;  %p3337_p7 = scmp.lt.u32.totalorder %s3558_s27, %s4423_s0 }
  0x34   : > { %p3334_p3 = pnand %p3333_p0, %p3332_p13  ;;  %p3338_p9 = scmp.lt.u32.totalorder %s3336_s4, %s3331_s29 }
  0x35   : > { %p3340_p1 = scmp.lt.u32.totalorder %s3331_s29, %s3558_s27 }
  0x36   : > { %p3335_p5 = pneg %p3334_p3  ;;  %p3339_p2 = por %p3338_p9, %p3337_p7 }
  0x38   : > { %p3341_p4 = por %p3340_p1, %p3339_p2 }
  0x3a   : > { %p3342_p6 = pnand %p3341_p4, %p3335_p5 }
  0x3c   : > { %3345 = shalt.err (!%p3342_p6)
}
  0x3d   : > { %s3346_s7 = scalar_lea.vmem %s3564_s23, 12288  ;;  %s3436_s18 = smov [#allocation2]  }
  0x3e   : > { %p3347_p8 = scmp.ne.s32.totalorder %s3564_s23, %s3346_s7  ;;  %s3351_s24 = sshll.u32 %s3436_s18, 4  ;;  %s3352_s24 = int_to_ptr.vmem [resolvable:$false] %s3351_s24 }
  0x3f   : > { %s3353_s25 = scalar_lea.vmem %s3352_s24, 24576  ;;  %p3354_p3 = scmp.lt.s32.totalorder %s3564_s23, %s3352_s24 }
  0x40   : > { %p3349_p10 = pnand %p3347_p8, %p3333_p0  ;;  %p3355_p7 = scmp.lt.s32.totalorder %s3353_s25, %s3346_s7 }
  0x42   : > { %p3350_p13 = pneg %p3349_p10  ;;  %p3356_p9 = por %p3355_p7, %p3354_p3 }
  0x44   : > { %p3357_p2 = pnand %p3356_p9, %p3350_p13 }
  0x46   : > { %3360 = shalt.err (!%p3357_p2)
}
  0x47   : > { %s3437_s20 = smov 384   ;;  %s3438_s26 = smov 24  }
  0x48   : > { %3030 = dma.hbm_to_vmem [thread:$0]  (!%p3560_p11), %s3558_s27, 12288, %s3564_s23, %s3566_s28, %s3437_s20, %s3437_s20, %s3438_s26  }
  0x49   : > { %p4436_p0 = scmp.ne.s32.totalorder %s4431_s17, 0 }
  0x4a   : > { %s3597_s22 = sand.u32 (!%p4436_p0), 1, %s3423_s10   ;;  %p4437_p5 = scmp.ne.s32.totalorder (!%p4436_p0), %s4429_s15, 0 }
  0x4b   : > { %147 = sbr.rel (%p4436_p0) target bundleno = 1417 (0x589), region = 28  ;;  %s150_s30 = scalar_lea.sflag (!%p4436_p0), [#allocation3], %s3597_s22 }
  0x4c   : > { %s3014_s29 = smul.u32 (!%p4436_p0), 768, %s3597_s22 }
  0x4e   : > { %s3601_s3 = scalar_lea.vmem (!%p4436_p0), [#allocation2], %s3014_s29 }
  0x52   : > { %3406 = dma.done.wait (%p4437_p5), %s150_s30, 12288  }
  0x53   : > { %3408 = vsyncadd (%p4437_p5), %s150_s30, 4294955008  ;;  %p4438_p11 = scmp.eq.s32.totalorder %s3479_s13, 0 }
  0x55   : > { %3410 = dma.done.wait (%p4438_p11), [#allocation6], 9216   ;;  %p4439_p1 = pmov %p4438_p11 }
  0x56   : > { %v3079_v0 = vld [vmem:[#allocation5 + $0x4] ss:$12 sps:$4 sm:$0xff]   ;;  %v3081_v1 = vld [vmem:[#allocation5] ss:$12 sps:$4 sm:$0xff]   ;;  %v3082_v2 = vld [vmem:[#allocation5 + $0x1c] ss:$12 sps:$4 sm:$0xff]  }
  0x57   : > { %3412 = vsyncadd (%p4439_p1), [#allocation6], 4294958080  ;;  %805 = vmatprep.subr.bf16.mxu0 %v3079_v0  ;;  %v3084_v3 = vld [vmem:[#allocation5 + $0x18] ss:$12 sps:$4 sm:$0xff]   ;;  %v3085_v4 = vld [vmem:[#allocation5 + $0x34] ss:$12 sps:$4 sm:$0xff]  }
  0x58   : > { %806 = vmatpush1.bf16.msra.mxu0 %v3081_v1  ;;  %v3087_v5 = vld [vmem:[#allocation5 + $0x30] ss:$12 sps:$4 sm:$0xff]   ;;  %v3088_v6 = vld [vmem:[#allocation5 + $0x4c] ss:$12 sps:$4 sm:$0xff]   ;;  %v3090_v7 = vld [vmem:[#allocation5 + $0x48] ss:$12 sps:$4 sm:$0xff]  }
  0x59   : > { %807 = vmatprep.subr.bf16.mxu0 %v3082_v2  ;;  %v3091_v8 = vld [vmem:[#allocation5 + $0x64] ss:$12 sps:$4 sm:$0xff]   ;;  %v3093_v9 = vld [vmem:[#allocation5 + $0x60] ss:$12 sps:$4 sm:$0xff]   ;;  %v3094_v10 = vld [vmem:[#allocation5 + $0x7c] ss:$12 sps:$4 sm:$0xff]  }
  0x5a   : > { %v3096_v11 = vld [vmem:[#allocation5 + $0x78] ss:$12 sps:$4 sm:$0xff]   ;;  %v3097_v12 = vld [vmem:[#allocation5 + $0x94] ss:$12 sps:$4 sm:$0xff]   ;;  %v182_v13 = vld [vmem:[%s3601_s3 + $0x8] sm:$0xff]  ;;  %s2491_s15 = sshll.u32 %s3597_s22, 8 }
  0x5b   : > { %v185_v14 = vld [vmem:[%s3601_s3 + $0x20] sm:$0xff]  ;;  %v3099_v16 = vld [vmem:[#allocation5 + $0x90] ss:$12 sps:$4 sm:$0xff]   ;;  %v3100_v17 = vld [vmem:[#allocation5 + $0xac] ss:$12 sps:$4 sm:$0xff]   ;;  %s4338_s17 = scalar_lea.vmem [#allocation7], %s2491_s15 }
  0x5c   : > { %808 = vmatpush1.bf16.msra.mxu0 %v3084_v3  ;;  %v278_v15 = vpack.c.bf16 %v185_v14, %v182_v13  ;;  %v3102_v18 = vld [vmem:[#allocation5 + $0xa8] ss:$12 sps:$4 sm:$0xff]   ;;  %v3103_v19 = vld [vmem:[#allocation5 + $0xc4] ss:$12 sps:$4 sm:$0xff]   ;;  %v3105_v20 = vld [vmem:[#allocation5 + $0xc0] ss:$12 sps:$4 sm:$0xff]  }
  0x5d   : > { %809 = vmatprep.subr.bf16.mxu0 %v3085_v4  ;;  %v3106_v21 = vld [vmem:[#allocation5 + $0xdc] ss:$12 sps:$4 sm:$0xff]   ;;  %v3108_v22 = vld [vmem:[#allocation5 + $0xd8] ss:$12 sps:$4 sm:$0xff]   ;;  %v3109_v23 = vld [vmem:[#allocation5 + $0xf4] ss:$12 sps:$4 sm:$0xff]  }
  0x5e   : > { %837 = vmatprep.mubr.bf16.mxu0 %v278_v15  ;;  %1223 = vmatprep.mubr.bf16.mxu1 %v278_v15  ;;  %v3111_v24 = vld [vmem:[#allocation5 + $0xf0] ss:$12 sps:$4 sm:$0xff]   ;;  %v3112_v25 = vld [vmem:[#allocation5 + $0x10c] ss:$12 sps:$4 sm:$0xff]   ;;  %v3139_v26 = vld [vmem:[#allocation5 + $0xc8] ss:$12 sps:$4 sm:$0xff]  }
  0x5f   : > { %v3140_v27 = vld [vmem:[#allocation5 + $0x8] ss:$12 sps:$4 sm:$0xff]   ;;  %2572 = vmatprep.subr.bf16.mxu1 %v3139_v26  ;;  %v3141_v28 = vld [vmem:[#allocation5 + $0xe0] ss:$12 sps:$4 sm:$0xff]   ;;  %v3115_v31 = vld [vmem:[#allocation5 + $0x124] ss:$12 sps:$4 sm:$0xff]  }
  0x60   : > { %810 = vmatpush1.bf16.msra.mxu0 %v3087_v5  ;;  %2573 = vmatpush3.bf16.msra.mxu1 %v3140_v27  ;;  %v3142_v29 = vld [vmem:[#allocation5 + $0x20] ss:$12 sps:$4 sm:$0xff]   ;;  %v3114_v30 = vld [vmem:[#allocation5 + $0x108] ss:$12 sps:$4 sm:$0xff]   ;;  %v3146_v32 = vld [vmem:[#allocation5 + $0xf8] ss:$12 sps:$4 sm:$0xff]  }
  0x61   : > { %811 = vmatprep.subr.bf16.mxu0 %v3088_v6  ;;  %2574 = vmatprep.subr.bf16.mxu1 %v3141_v28  ;;  %v3147_v33 = vld [vmem:[#allocation5 + $0x38] ss:$12 sps:$4 sm:$0xff]   ;;  %v3148_v34 = vld [vmem:[#allocation5 + $0x110] ss:$12 sps:$4 sm:$0xff]   ;;  %v3117_v35 = vld [vmem:[#allocation5 + $0x120] ss:$12 sps:$4 sm:$0xff]  }
  0x62   : > { %v3118_v36 = vld [vmem:[#allocation5 + $0x13c] ss:$12 sps:$4 sm:$0xff]   ;;  %v3120_v39 = vld [vmem:[#allocation5 + $0x138] ss:$12 sps:$4 sm:$0xff]   ;;  %v3121_v40 = vld [vmem:[#allocation5 + $0x154] ss:$12 sps:$4 sm:$0xff]  }
  0x63   : > { %v3149_v37 = vld [vmem:[#allocation5 + $0x50] ss:$12 sps:$4 sm:$0xff]   ;;  %v3150_v38 = vld [vmem:[#allocation5 + $0x128] ss:$12 sps:$4 sm:$0xff]   ;;  %v3152_v42 = vld [vmem:[#allocation5 + $0x140] ss:$12 sps:$4 sm:$0xff]  }
  0x64   : > { %812 = vmatpush1.bf16.msra.mxu0 %v3090_v7  ;;  %2575 = vmatpush3.bf16.msra.mxu1 %v3142_v29  ;;  %v3151_v41 = vld [vmem:[#allocation5 + $0x68] ss:$12 sps:$4 sm:$0xff]   ;;  %v3123_v43 = vld [vmem:[#allocation5 + $0x150] ss:$12 sps:$4 sm:$0xff]   ;;  %v3124_v44 = vld [vmem:[#allocation5 + $0x16c] ss:$12 sps:$4 sm:$0xff]  }
  0x65   : > { %813 = vmatprep.subr.bf16.mxu0 %v3091_v8  ;;  %2576 = vmatprep.subr.bf16.mxu1 %v3146_v32  ;;  %v3126_v45 = vld [vmem:[#allocation5 + $0x168] ss:$12 sps:$4 sm:$0xff]   ;;  %v181_v46 = vld [vmem:[%s3601_s3] sm:$0xff]  ;;  %v184_v49 = vld [vmem:[%s3601_s3 + $0x18] sm:$0xff]  ;;  %s2571_s27 = sshll.u32 %s3479_s13, 12  ;;  %s2399_s19 = sshll.u32 %s4338_s17, 4  ;;  %s4376_s19 = int_to_ptr.vmem [resolvable:$true] %s2399_s19 }
  0x66   : > { %v3153_v47 = vld [vmem:[#allocation5 + $0x80] ss:$12 sps:$4 sm:$0xff]   ;;  %v3157_v48 = vld [vmem:[#allocation5 + $0x158] ss:$12 sps:$4 sm:$0xff]   ;;  %v191_v52 = vld [vmem:[%s3601_s3 + $0x50] sm:$0xff]  ;;  %v277_v54 = vpack.c.bf16 %v184_v49, %v181_v46  ;;  %s4374_s4 = scalar_lea.hbm %s4425_s2, %s2571_s27  ;;  %s2385_s13 = scalar_lea.sflag [#allocation4], %s3597_s22 }
  0x67   : > { %v3129_v50 = vld [vmem:[#allocation5 + $0x184] ss:$12 sps:$4 sm:$0xff]   ;;  %v188_v51 = vld [vmem:[%s3601_s3 + $0x38] sm:$0xff]  ;;  %v3127_v56 = vld [vmem:[#allocation5 + $0x180] ss:$12 sps:$4 sm:$0xff]   ;;  %s3361_s5 = scalar_lea.vmem %s4376_s19, 4096 }
  0x68   : > { %814 = vmatpush1.bf16.msra.mxu0 %v3093_v9  ;;  %2577 = vmatpush3.bf16.msra.mxu1 %v3147_v33  ;;  %v3158_v53 = vld [vmem:[#allocation5 + $0x98] ss:$12 sps:$4 sm:$0xff]   ;;  %v3159_v55 = vld [vmem:[#allocation5 + $0x170] ss:$12 sps:$4 sm:$0xff]   ;;  %v281_v57 = vpack.c.bf16 %v191_v52, %v188_v51  ;;  %v190_v61 = vld [vmem:[%s3601_s3 + $0x48] sm:$0xff]  ;;  %p3362_p4 = scmp.ne.s32.totalorder %s4376_s19, %s3361_s5  ;;  %s3440_s6 = smov [#allocation7]  }
  0x69   : > { %815 = vmatprep.subr.bf16.mxu0 %v3094_v10  ;;  %2578 = vmatprep.subr.bf16.mxu1 %v3148_v34  ;;  %v3132_v58 = vld [vmem:[#allocation5 + $0x19c] ss:$12 sps:$4 sm:$0xff]   ;;  %v187_v60 = vld [vmem:[%s3601_s3 + $0x30] sm:$0xff]  ;;  %v3130_v62 = vld [vmem:[#allocation5 + $0x198] ss:$12 sps:$4 sm:$0xff]   ;;  %s3365_s7 = sshll.u32 %s3440_s6, 4  ;;  %s3366_s7 = int_to_ptr.vmem [resolvable:$false] %s3365_s7 }
  0x6a   : > { %v3160_v59 = vld [vmem:[#allocation5 + $0xb0] ss:$12 sps:$4 sm:$0xff]   ;;  %v194_v63 = vld [vmem:[%s3601_s3 + $0x68] sm:$0xff]  ;;  %v197_v0 = vld [vmem:[%s3601_s3 + $0x80] sm:$0xff]  ;;  %v280_v2 = vpack.c.bf16 %v190_v61, %v187_v60  ;;  %p3363_p6 = pnand %p3362_p4, %p3549_p12  ;;  %s3367_s18 = scalar_lea.vmem %s3366_s7, 8192 }
  0x6b   : > { %v3135_v1 = vld [vmem:[#allocation5 + $0x1b4] ss:$12 sps:$4 sm:$0xff]   ;;  %v3133_v3 = vld [vmem:[#allocation5 + $0x1b0] ss:$12 sps:$4 sm:$0xff]   ;;  %v3138_v4 = vld [vmem:[#allocation5 + $0x1cc] ss:$12 sps:$4 sm:$0xff]   ;;  %v284_v5 = vpack.c.bf16 %v197_v0, %v194_v63  ;;  %p3368_p10 = scmp.lt.s32.totalorder %s4376_s19, %s3366_s7  ;;  %p3369_p13 = scmp.lt.s32.totalorder %s3367_s18, %s3361_s5 }
  0x6c   : > { %816 = vmatpush1.bf16.msra.mxu0 %v3096_v11  ;;  %2579 = vmatpush3.bf16.msra.mxu1 %v3149_v37  ;;  %v193_v6 = vld [vmem:[%s3601_s3 + $0x60] sm:$0xff]  ;;  %v196_v7 = vld [vmem:[%s3601_s3 + $0x78] sm:$0xff]  ;;  %v203_v9 = vld [vmem:[%s3601_s3 + $0xb0] sm:$0xff]  ;;  %p3364_p8 = pneg %p3363_p6 }
  0x6d   : > { %817 = vmatprep.subr.bf16.mxu0 %v3097_v12  ;;  %2580 = vmatprep.subr.bf16.mxu1 %v3150_v38  ;;  %v200_v8 = vld [vmem:[%s3601_s3 + $0x98] sm:$0xff]  ;;  %v3136_v10 = vld [vmem:[#allocation5 + $0x1c8] ss:$12 sps:$4 sm:$0xff]   ;;  %v3145_v11 = vld [vmem:[#allocation5 + $0x1e4] ss:$12 sps:$4 sm:$0xff]   ;;  %v283_v12 = vpack.c.bf16 %v196_v7, %v193_v6  ;;  %p3370_p3 = por %p3369_p13, %p3368_p10 }
  0x6e   : > { %v287_v13 = vpack.c.bf16 %v203_v9, %v200_v8  ;;  %v3143_v14 = vld [vmem:[#allocation5 + $0x1e0] ss:$12 sps:$4 sm:$0xff]   ;;  %v3156_v15 = vld [vmem:[#allocation5 + $0x1fc] ss:$12 sps:$4 sm:$0xff]   ;;  %v211_v33 = vld [vmem:[%s3601_s3 + $0xf0] sm:$0xff] }
  0x6f   : > { %v205_v26 = vld [vmem:[%s3601_s3 + $0xc0] sm:$0xff]  ;;  %v208_v27 = vld [vmem:[%s3601_s3 + $0xd8] sm:$0xff]  ;;  %v3164_v28 = vld [vmem:[#allocation5 + $0x228] ss:$12 sps:$4 sm:$0xff]   ;;  %p3371_p7 = pnand %p3370_p3, %p3364_p8 }
  0x70   : > { %818 = vmatpush1.bf16.msra.mxu0 %v3099_v16  ;;  %2581 = vmatpush3.bf16.msra.mxu1 %v3151_v41  ;;  %v199_v16 = vld [vmem:[%s3601_s3 + $0x90] sm:$0xff]  ;;  %v212_v29 = vld [vmem:[%s3601_s3 + $0xf8] sm:$0xff]  ;;  %v214_v34 = vld [vmem:[%s3601_s3 + $0x108] sm:$0xff] }
  0x71   : > { %819 = vmatprep.subr.bf16.mxu0 %v3100_v17  ;;  %2582 = vmatprep.subr.bf16.mxu1 %v3152_v42  ;;  %v202_v17 = vld [vmem:[%s3601_s3 + $0xa8] sm:$0xff]  ;;  %v292_v37 = vpack.c.bf16 %v214_v34, %v211_v33  ;;  %v224_v41 = vld [vmem:[%s3601_s3 + $0x158] sm:$0xff]  ;;  %v227_v42 = vld [vmem:[%s3601_s3 + $0x170] sm:$0xff] }
  0x72   : > { %v226_v46 = vld [vmem:[%s3601_s3 + $0x168] sm:$0xff]  ;;  %v3170_v60 = vld [vmem:[#allocation5 + $0x1d0] ss:$12 sps:$4 sm:$0xff]   ;;  %v245_v0 = vld [vmem:[%s3601_s3 + $0x200] sm:$0xff] }
  0x73   : > { %v3167_v51 = vld [vmem:[#allocation5 + $0x188] ss:$12 sps:$4 sm:$0xff]   ;;  %v3168_v52 = vld [vmem:[#allocation5 + $0x1a0] ss:$12 sps:$4 sm:$0xff]   ;;  %v244_v6 = vld [vmem:[%s3601_s3 + $0x1f8] sm:$0xff] }
  0x74   : > { %820 = vmatpush1.bf16.msra.mxu0 %v3102_v18  ;;  %2583 = vmatpush3.bf16.msra.mxu1 %v3153_v47  ;;  %v3154_v18 = vld [vmem:[#allocation5 + $0x1f8] ss:$12 sps:$4 sm:$0xff]   ;;  %v230_v47 = vld [vmem:[%s3601_s3 + $0x188] sm:$0xff]  ;;  %v235_v61 = vld [vmem:[%s3601_s3 + $0x1b0] sm:$0xff] }
  0x75   : > { %821 = vmatprep.subr.bf16.mxu0 %v3103_v19  ;;  %2584 = vmatprep.subr.bf16.mxu1 %v3157_v48  ;;  %v206_v19 = vld [vmem:[%s3601_s3 + $0xc8] sm:$0xff]  ;;  %v233_v48 = vld [vmem:[%s3601_s3 + $0x1a0] sm:$0xff]  ;;  %v248_v7 = vld [vmem:[%s3601_s3 + $0x218] sm:$0xff] }
  0x76   : > { %v242_v63 = vld [vmem:[%s3601_s3 + $0x1e8] sm:$0xff]  ;;  %v251_v8 = vld [vmem:[%s3601_s3 + $0x230] sm:$0xff]  ;;  %v272_v33 = vld [vmem:[%s3601_s3 + $0x2d8] sm:$0xff] }
  0x77   : > { %v275_v34 = vld [vmem:[%s3601_s3 + $0x2f0] sm:$0xff] }
  0x78   : > { %822 = vmatpush1.bf16.msra.mxu0 %v3105_v20  ;;  %2585 = vmatpush3.bf16.msra.mxu1 %v3158_v53  ;;  %v209_v20 = vld [vmem:[%s3601_s3 + $0xe0] sm:$0xff] }
  0x79   : > { %823 = vmatprep.subr.bf16.mxu0 %v3106_v21  ;;  %2586 = vmatprep.subr.bf16.mxu1 %v3159_v55  ;;  %v3163_v21 = vld [vmem:[#allocation5 + $0x214] ss:$12 sps:$4 sm:$0xff]   ;;  %v236_v55 = vld [vmem:[%s3601_s3 + $0x1b8] sm:$0xff] }
  0x7a   : > { %v229_v53 = vld [vmem:[%s3601_s3 + $0x180] sm:$0xff] }
  0x7c   : > { %824 = vmatpush1.bf16.msra.mxu0 %v3108_v22  ;;  %2587 = vmatpush3.bf16.msra.mxu1 %v3160_v59  ;;  %v286_v22 = vpack.c.bf16 %v202_v17, %v199_v16  ;;  %v3169_v59 = vld [vmem:[#allocation5 + $0x1b8] ss:$12 sps:$4 sm:$0xff]  }
  0x7d   : > { %825 = vmatprep.subr.bf16.mxu0 %v3109_v23  ;;  %v290_v23 = vpack.c.bf16 %v209_v20, %v206_v19  ;;  %2772 = vmatprep.subr.bf16.mxu1 %v3167_v51  ;;  %v257_v16 = vld [vmem:[%s3601_s3 + $0x260] sm:$0xff]  ;;  %v256_v20 = vld [vmem:[%s3601_s3 + $0x258] sm:$0xff] }
  0x7e   : > { %v253_v19 = vld [vmem:[%s3601_s3 + $0x240] sm:$0xff] }
  0x7f   : > { %1224 = vmatmul.mubr.bf16.vlgmr.msra.gmra.mrb[0].mxu1 %v277_v54 }
  0x80   : > { %826 = vmatpush1.bf16.msra.mxu0 %v3111_v24  ;;  %1231 = vmatprep.mubr.bf16.mxu1 %v281_v57  ;;  %v3161_v24 = vld [vmem:[#allocation5 + $0x210] ss:$12 sps:$4 sm:$0xff]  }
  0x81   : > { %827 = vmatprep.subr.bf16.mxu0 %v3112_v25  ;;  %v3166_v25 = vld [vmem:[#allocation5 + $0x22c] ss:$12 sps:$4 sm:$0xff]   ;;  %2773 = vmatpush3.bf16.msra.mxu1 %v3167_v51 }
  0x82   : > { %2774 = vmatprep.subr.bf16.mxu1 %v3168_v52  ;;  %v204_v51 = vld [vmem:[%s3601_s3 + $0xb8] sm:$0xff] }
  0x84   : > { %828 = vmatpush1.bf16.msra.mxu0 %v3114_v30  ;;  %v215_v30 = vld [vmem:[%s3601_s3 + $0x110] sm:$0xff] }
  0x85   : > { %829 = vmatprep.subr.bf16.mxu0 %v3115_v31  ;;  %v289_v31 = vpack.c.bf16 %v208_v27, %v205_v26  ;;  %v293_v32 = vpack.c.bf16 %v215_v30, %v212_v29  ;;  %2775 = vmatpush3.bf16.msra.mxu1 %v3168_v52  ;;  %v262_v26 = vld [vmem:[%s3601_s3 + $0x288] sm:$0xff]  ;;  %v207_v52 = vld [vmem:[%s3601_s3 + $0xd0] sm:$0xff] }
  0x86   : > { %2776 = vmatprep.subr.bf16.mxu1 %v3169_v59  ;;  %v266_v27 = vld [vmem:[%s3601_s3 + $0x2a8] sm:$0xff] }
  0x87   : > { %1232 = vmatmul.mubr.bf16.gmra.mrb[4].mxu1 %v280_v2 }
  0x88   : > { %830 = vmatpush1.bf16.msra.mxu0 %v3117_v35  ;;  %1239 = vmatprep.mubr.bf16.mxu1 %v284_v5  ;;  %v218_v35 = vld [vmem:[%s3601_s3 + $0x128] sm:$0xff] }
  0x89   : > { %831 = vmatprep.subr.bf16.mxu0 %v3118_v36  ;;  %v221_v36 = vld [vmem:[%s3601_s3 + $0x140] sm:$0xff]  ;;  %2777 = vmatpush3.bf16.msra.mxu1 %v3169_v59  ;;  %v222_v59 = vld [vmem:[%s3601_s3 + $0x148] sm:$0xff] }
  0x8a   : > { %v296_v38 = vpack.c.bf16 %v221_v36, %v218_v35  ;;  %2778 = vmatprep.subr.bf16.mxu1 %v3170_v60  ;;  %v323_v36 = vpack.c.bf16 %v275_v34, %v272_v33 }
  0x8c   : > { %832 = vmatpush1.bf16.msra.mxu0 %v3120_v39  ;;  %v217_v39 = vld [vmem:[%s3601_s3 + $0x120] sm:$0xff] }
  0x8d   : > { %833 = vmatprep.subr.bf16.mxu0 %v3121_v40  ;;  %v220_v40 = vld [vmem:[%s3601_s3 + $0x138] sm:$0xff]  ;;  %2779 = vmatpush3.bf16.msra.mxu1 %v3170_v60 }
  0x8f   : > { %1240 = vmatmul.mubr.bf16.gmra.mrb[8].mxu1 %v283_v12 }
  0x90   : > { %834 = vmatpush1.bf16.msra.mxu0 %v3123_v43  ;;  %1247 = vmatprep.mubr.bf16.mxu1 %v287_v13  ;;  %v295_v43 = vpack.c.bf16 %v220_v40, %v217_v39  ;;  %v3439_v40 = vmov 0  }
  0x91   : > { %835 = vmatprep.subr.bf16.mxu0 %v3124_v44  ;;  %v299_v44 = vpack.c.bf16 %v227_v42, %v224_v41  ;;  %v183_v41 = vld [vmem:[%s3601_s3 + $0x10] sm:$0xff]  ;;  %v186_v42 = vld [vmem:[%s3601_s3 + $0x28] sm:$0xff] }
  0x94   : > { %836 = vmatpush1.bf16.msra.mxu0 %v3126_v45  ;;  %v223_v45 = vld [vmem:[%s3601_s3 + $0x150] sm:$0xff] }
  0x95   : > { %998 = vmatprep.subr.bf16.mxu0 %v3129_v50  ;;  %v298_v49 = vpack.c.bf16 %v226_v46, %v223_v45  ;;  %v302_v50 = vpack.c.bf16 %v233_v48, %v230_v47  ;;  %v192_v45 = vld [vmem:[%s3601_s3 + $0x58] sm:$0xff]  ;;  %v195_v46 = vld [vmem:[%s3601_s3 + $0x70] sm:$0xff]  ;;  %v198_v47 = vld [vmem:[%s3601_s3 + $0x88] sm:$0xff] }
  0x97   : > { %838 = vmatmul.mubr.bf16.vlgmr.msra.gmra.mrb[0].mxu0 %v277_v54  ;;  %1248 = vmatmul.mubr.bf16.gmra.mrb[12].mxu1 %v286_v22  ;;  %v232_v54 = vld [vmem:[%s3601_s3 + $0x198] sm:$0xff] }
  0x98   : > { %999 = vmatpush1.bf16.msra.mxu0 %v3127_v56  ;;  %847 = vmatprep.mubr.bf16.mxu0 %v281_v57  ;;  %v239_v56 = vld [vmem:[%s3601_s3 + $0x1d0] sm:$0xff]  ;;  %v301_v57 = vpack.c.bf16 %v232_v54, %v229_v53  ;;  %v210_v53 = vld [vmem:[%s3601_s3 + $0xe8] sm:$0xff] }
  0x99   : > { %1000 = vmatprep.subr.bf16.mxu0 %v3132_v58  ;;  %1255 = vmatprep.mubr.bf16.mxu1 %v290_v23  ;;  %v305_v58 = vpack.c.bf16 %v239_v56, %v236_v55  ;;  %v291_v55 = vpack.c.bf16 %v210_v53, %v207_v52  ;;  %v213_v56 = vld [vmem:[%s3601_s3 + $0x100] sm:$0xff] }
  0x9c   : > { %1001 = vmatpush1.bf16.msra.mxu0 %v3130_v62  ;;  %v238_v62 = vld [vmem:[%s3601_s3 + $0x1c8] sm:$0xff] }
  0x9d   : > { %1002 = vmatprep.subr.bf16.mxu0 %v3135_v1  ;;  %v304_v1 = vpack.c.bf16 %v238_v62, %v235_v61  ;;  %v225_v62 = vld [vmem:[%s3601_s3 + $0x160] sm:$0xff] }
  0x9f   : > { %848 = vmatmul.mubr.bf16.gmra.mrb[4].mxu0 %v280_v2  ;;  %1256 = vmatmul.mubr.bf16.gmra.mrb[16].mxu1 %v289_v31  ;;  %v308_v2 = vpack.c.bf16 %v245_v0, %v242_v63  ;;  %v228_v63 = vld [vmem:[%s3601_s3 + $0x178] sm:$0xff]  ;;  %v231_v0 = vld [vmem:[%s3601_s3 + $0x190] sm:$0xff] }
  0xa0   : > { %857 = vmatprep.mubr.bf16.mxu0 %v284_v5  ;;  %1003 = vmatpush1.bf16.msra.mxu0 %v3133_v3  ;;  %v3171_v3 = vld [vmem:[#allocation5 + $0x1e8] ss:$12 sps:$4 sm:$0xff]   ;;  %v241_v5 = vld [vmem:[%s3601_s3 + $0x1e0] sm:$0xff] }
  0xa1   : > { %1004 = vmatprep.subr.bf16.mxu0 %v3138_v4  ;;  %1263 = vmatprep.mubr.bf16.mxu1 %v293_v32  ;;  %v3172_v4 = vld [vmem:[#allocation5 + $0x200] ss:$12 sps:$4 sm:$0xff]   ;;  %v307_v9 = vpack.c.bf16 %v244_v6, %v241_v5  ;;  %v240_v5 = vld [vmem:[%s3601_s3 + $0x1d8] sm:$0xff]  ;;  %v243_v6 = vld [vmem:[%s3601_s3 + $0x1f0] sm:$0xff] }
  0xa2   : > { %2780 = vmatprep.subr.bf16.mxu1 %v3171_v3 }
  0xa3   : > { %2781 = vmatpush3.bf16.msra.mxu1 %v3171_v3 }
  0xa4   : > { %1005 = vmatpush1.bf16.msra.mxu0 %v3136_v10  ;;  %2782 = vmatprep.subr.bf16.mxu1 %v3172_v4  ;;  %v311_v10 = vpack.c.bf16 %v251_v8, %v248_v7  ;;  %v246_v7 = vld [vmem:[%s3601_s3 + $0x208] sm:$0xff] }
  0xa5   : > { %1006 = vmatprep.subr.bf16.mxu0 %v3145_v11  ;;  %v3173_v11 = vld [vmem:[#allocation5 + $0x218] ss:$12 sps:$4 sm:$0xff]  }
  0xa7   : > { %858 = vmatmul.mubr.bf16.gmra.mrb[8].mxu0 %v283_v12  ;;  %1264 = vmatmul.mubr.bf16.gmra.mrb[20].mxu1 %v292_v37  ;;  %v3174_v12 = vld [vmem:[#allocation5 + $0x230] ss:$12 sps:$4 sm:$0xff]  }
  0xa8   : > { %867 = vmatprep.mubr.bf16.mxu0 %v287_v13  ;;  %1007 = vmatpush1.bf16.msra.mxu0 %v3143_v14  ;;  %v247_v13 = vld [vmem:[%s3601_s3 + $0x210] sm:$0xff]  ;;  %v250_v14 = vld [vmem:[%s3601_s3 + $0x228] sm:$0xff] }
  0xa9   : > { %1008 = vmatprep.subr.bf16.mxu0 %v3156_v15  ;;  %1271 = vmatprep.mubr.bf16.mxu1 %v296_v38  ;;  %v254_v15 = vld [vmem:[%s3601_s3 + $0x248] sm:$0xff]  ;;  %v310_v17 = vpack.c.bf16 %v250_v14, %v247_v13 }
  0xaa   : > { %2783 = vmatpush3.bf16.msra.mxu1 %v3172_v4  ;;  %v237_v4 = vld [vmem:[%s3601_s3 + $0x1c0] sm:$0xff]  ;;  %v258_v13 = vld [vmem:[%s3601_s3 + $0x268] sm:$0xff] }
  0xab   : > { %2784 = vmatprep.subr.bf16.mxu1 %v3173_v11  ;;  %v306_v8 = vpack.c.bf16 %v240_v5, %v237_v4 }
  0xac   : > { %1009 = vmatpush1.bf16.msra.mxu0 %v3154_v18  ;;  %v314_v18 = vpack.c.bf16 %v257_v16, %v254_v15  ;;  %v261_v16 = vld [vmem:[%s3601_s3 + $0x280] sm:$0xff] }
  0xad   : > { %1010 = vmatprep.subr.bf16.mxu0 %v3163_v21  ;;  %v260_v21 = vld [vmem:[%s3601_s3 + $0x278] sm:$0xff] }
  0xae   : > { %2785 = vmatpush3.bf16.msra.mxu1 %v3173_v11  ;;  %v252_v11 = vld [vmem:[%s3601_s3 + $0x238] sm:$0xff] }
  0xaf   : > { %868 = vmatmul.mubr.bf16.gmra.mrb[12].mxu0 %v286_v22  ;;  %1272 = vmatmul.mubr.bf16.gmra.mrb[24].mxu1 %v295_v43  ;;  %v263_v22 = vld [vmem:[%s3601_s3 + $0x290] sm:$0xff] }
  0xb0   : > { %877 = vmatprep.mubr.bf16.mxu0 %v290_v23  ;;  %1011 = vmatpush1.bf16.msra.mxu0 %v3161_v24  ;;  %v313_v23 = vpack.c.bf16 %v256_v20, %v253_v19  ;;  %v317_v24 = vpack.c.bf16 %v263_v22, %v260_v21  ;;  %v270_v19 = vld [vmem:[%s3601_s3 + $0x2c8] sm:$0xff]  ;;  %v273_v22 = vld [vmem:[%s3601_s3 + $0x2e0] sm:$0xff] }
  0xb1   : > { %1012 = vmatprep.subr.bf16.mxu0 %v3166_v25  ;;  %1279 = vmatprep.mubr.bf16.mxu1 %v299_v44  ;;  %v259_v25 = vld [vmem:[%s3601_s3 + $0x270] sm:$0xff] }
  0xb2   : > { %2786 = vmatprep.subr.bf16.mxu1 %v3174_v12  ;;  %v316_v29 = vpack.c.bf16 %v262_v26, %v259_v25 }
  0xb3   : > { %2787 = vmatpush3.bf16.msra.mxu1 %v3174_v12  ;;  %v255_v12 = vld [vmem:[%s3601_s3 + $0x250] sm:$0xff] }
  0xb4   : > { %1013 = vmatpush1.bf16.msra.mxu0 %v3164_v28  ;;  %v269_v28 = vld [vmem:[%s3601_s3 + $0x2c0] sm:$0xff]  ;;  %v315_v15 = vpack.c.bf16 %v258_v13, %v255_v12 }
  0xb5   : > { %v320_v30 = vpack.c.bf16 %v269_v28, %v266_v27 }
  0xb7   : > { %878 = vmatmul.mubr.bf16.gmra.mrb[16].mxu0 %v289_v31  ;;  %1280 = vmatmul.mubr.bf16.gmra.mrb[28].mxu1 %v298_v49  ;;  %v265_v31 = vld [vmem:[%s3601_s3 + $0x2a0] sm:$0xff] }
  0xb8   : > { %887 = vmatprep.mubr.bf16.mxu0 %v293_v32  ;;  %1287 = vmatprep.mubr.bf16.mxu1 %v302_v50  ;;  %v268_v32 = vld [vmem:[%s3601_s3 + $0x2b8] sm:$0xff] }
  0xb9   : > { %v319_v35 = vpack.c.bf16 %v268_v32, %v265_v31 }
  0xbf   : > { %888 = vmatmul.mubr.bf16.gmra.mrb[20].mxu0 %v292_v37  ;;  %1288 = vmatmul.mubr.bf16.gmra.mrb[32].mxu1 %v301_v57  ;;  %v271_v37 = vld [vmem:[%s3601_s3 + $0x2d0] sm:$0xff] }
  0xc0   : > { %897 = vmatprep.mubr.bf16.mxu0 %v296_v38  ;;  %1295 = vmatprep.mubr.bf16.mxu1 %v305_v58  ;;  %v274_v38 = vld [vmem:[%s3601_s3 + $0x2e8] sm:$0xff] }
  0xc1   : > { %v322_v39 = vpack.c.bf16 %v274_v38, %v271_v37 }
  0xc7   : > { %898 = vmatmul.mubr.bf16.gmra.mrb[24].mxu0 %v295_v43  ;;  %1296 = vmatmul.mubr.bf16.gmra.mrb[36].mxu1 %v304_v1  ;;  %v279_v43 = vpack.c.bf16 %v186_v42, %v183_v41 }
  0xc8   : > { %907 = vmatprep.mubr.bf16.mxu0 %v299_v44  ;;  %1303 = vmatprep.mubr.bf16.mxu1 %v308_v2  ;;  %v189_v44 = vld [vmem:[%s3601_s3 + $0x40] sm:$0xff] }
  0xc9   : > { %v282_v48 = vpack.c.bf16 %v192_v45, %v189_v44 }
  0xcf   : > { %908 = vmatmul.mubr.bf16.gmra.mrb[28].mxu0 %v298_v49  ;;  %1304 = vmatmul.mubr.bf16.gmra.mrb[40].mxu1 %v307_v9  ;;  %v285_v49 = vpack.c.bf16 %v198_v47, %v195_v46 }
  0xd0   : > { %917 = vmatprep.mubr.bf16.mxu0 %v302_v50  ;;  %1311 = vmatprep.mubr.bf16.mxu1 %v311_v10  ;;  %v201_v50 = vld [vmem:[%s3601_s3 + $0xa0] sm:$0xff] }
  0xd1   : > { %v288_v54 = vpack.c.bf16 %v204_v51, %v201_v50 }
  0xd7   : > { %918 = vmatmul.mubr.bf16.gmra.mrb[32].mxu0 %v301_v57  ;;  %1312 = vmatmul.mubr.bf16.gmra.mrb[44].mxu1 %v310_v17  ;;  %v216_v57 = vld [vmem:[%s3601_s3 + $0x118] sm:$0xff] }
  0xd8   : > { %927 = vmatprep.mubr.bf16.mxu0 %v305_v58  ;;  %1319 = vmatprep.mubr.bf16.mxu1 %v314_v18  ;;  %v219_v58 = vld [vmem:[%s3601_s3 + $0x130] sm:$0xff]  ;;  %v294_v60 = vpack.c.bf16 %v216_v57, %v213_v56 }
  0xd9   : > { %v297_v61 = vpack.c.bf16 %v222_v59, %v219_v58 }
  0xdf   : > { %928 = vmatmul.mubr.bf16.gmra.mrb[36].mxu0 %v304_v1  ;;  %1320 = vmatmul.mubr.bf16.gmra.mrb[48].mxu1 %v313_v23  ;;  %v234_v1 = vld [vmem:[%s3601_s3 + $0x1a8] sm:$0xff] }
  0xe0   : > { %937 = vmatprep.mubr.bf16.mxu0 %v308_v2  ;;  %1327 = vmatprep.mubr.bf16.mxu1 %v317_v24  ;;  %v300_v2 = vpack.c.bf16 %v228_v63, %v225_v62  ;;  %v303_v3 = vpack.c.bf16 %v234_v1, %v231_v0 }
  0xe7   : > { %938 = vmatmul.mubr.bf16.gmra.mrb[40].mxu0 %v307_v9  ;;  %1328 = vmatmul.mubr.bf16.gmra.mrb[52].mxu1 %v316_v29  ;;  %v309_v9 = vpack.c.bf16 %v246_v7, %v243_v6 }
  0xe8   : > { %947 = vmatprep.mubr.bf16.mxu0 %v311_v10  ;;  %1335 = vmatprep.mubr.bf16.mxu1 %v320_v30  ;;  %v249_v10 = vld [vmem:[%s3601_s3 + $0x220] sm:$0xff] }
  0xe9   : > { %v312_v14 = vpack.c.bf16 %v252_v11, %v249_v10 }
  0xef   : > { %948 = vmatmul.mubr.bf16.gmra.mrb[44].mxu0 %v310_v17  ;;  %1336 = vmatmul.mubr.bf16.gmra.mrb[56].mxu1 %v319_v35  ;;  %v264_v17 = vld [vmem:[%s3601_s3 + $0x298] sm:$0xff] }
  0xf0   : > { %957 = vmatprep.mubr.bf16.mxu0 %v314_v18  ;;  %1343 = vmatprep.mubr.bf16.mxu1 %v323_v36  ;;  %v267_v18 = vld [vmem:[%s3601_s3 + $0x2b0] sm:$0xff]  ;;  %v318_v20 = vpack.c.bf16 %v264_v17, %v261_v16 }
  0xf1   : > { %v321_v21 = vpack.c.bf16 %v270_v19, %v267_v18 }
  0xf7   : > { %958 = vmatmul.mubr.bf16.gmra.mrb[48].mxu0 %v313_v23  ;;  %1344 = vmatmul.mubr.bf16.gmra.mrb[60].mxu1 %v322_v39  ;;  %v276_v23 = vld [vmem:[%s3601_s3 + $0x2f8] sm:$0xff] }
  0xf8   : > { %967 = vmatprep.mubr.bf16.mxu0 %v317_v24  ;;  %2788 = vmatprep.mubr.bf16.mxu1 %v279_v43  ;;  %v324_v24 = vpack.c.bf16 %v276_v23, %v273_v22 }
  0xff   : > { %968 = vmatmul.mubr.bf16.gmra.mrb[52].mxu0 %v316_v29  ;;  %2789 = vmatmul.mubr.bf16.vlgmr.msra.gmra.mrb[64].mxu1 %v282_v48 }
 0x100   : > { %977 = vmatprep.mubr.bf16.mxu0 %v320_v30  ;;  %2792 = vmatprep.mubr.bf16.mxu1 %v285_v49 }
 0x107   : > { %978 = vmatmul.mubr.bf16.gmra.mrb[56].mxu0 %v319_v35  ;;  %2793 = vmatmul.mubr.bf16.gmra.mrb[68].mxu1 %v288_v54 }
 0x108   : > { %987 = vmatprep.mubr.bf16.mxu0 %v323_v36  ;;  %2796 = vmatprep.mubr.bf16.mxu1 %v291_v55 }
 0x10f   : > { %988 = vmatmul.mubr.bf16.gmra.mrb[60].mxu0 %v322_v39  ;;  %2797 = vmatmul.mubr.bf16.gmra.mrb[72].mxu1 %v294_v60 }
 0x110   : > { %1030 = vmatprep.mubr.bf16.mxu0 %v3439_v40  ;;  %2800 = vmatprep.mubr.bf16.mxu1 %v297_v61 }
 0x117   : > { %1031 = vmatmul.mubr.bf16.vlgmr.msra.gmra.mrb[0].mxu0 %v279_v43  ;;  %2801 = vmatmul.mubr.bf16.gmra.mrb[76].mxu1 %v300_v2 }
 0x118   : > { %1040 = vmatprep.mubr.bf16.mxu0 %v3439_v40  ;;  %2804 = vmatprep.mubr.bf16.mxu1 %v303_v3 }
 0x11f   : > { %1041 = vmatmul.mubr.bf16.gmra.mrb[4].mxu0 %v282_v48  ;;  %2805 = vmatmul.mubr.bf16.gmra.mrb[80].mxu1 %v306_v8 }
 0x120   : > { %1050 = vmatprep.mubr.bf16.mxu0 %v3439_v40  ;;  %2808 = vmatprep.mubr.bf16.mxu1 %v309_v9 }
 0x127   : > { %1051 = vmatmul.mubr.bf16.gmra.mrb[8].mxu0 %v285_v49  ;;  %2809 = vmatmul.mubr.bf16.gmra.mrb[84].mxu1 %v312_v14 }
 0x128   : > { %1060 = vmatprep.mubr.bf16.mxu0 %v3439_v40  ;;  %2812 = vmatprep.mubr.bf16.mxu1 %v315_v15 }
 0x12f   : > { %1061 = vmatmul.mubr.bf16.gmra.mrb[12].mxu0 %v288_v54  ;;  %2813 = vmatmul.mubr.bf16.gmra.mrb[88].mxu1 %v318_v20 }
 0x130   : > { %1070 = vmatprep.mubr.bf16.mxu0 %v3439_v40  ;;  %2816 = vmatprep.mubr.bf16.mxu1 %v321_v21 }
 0x137   : > { %1071 = vmatmul.mubr.bf16.gmra.mrb[16].mxu0 %v291_v55  ;;  %2817 = vmatmul.mubr.bf16.gmra.mrb[92].mxu1 %v324_v24 }
 0x138   : > { %1080 = vmatprep.mubr.bf16.mxu0 %v3439_v40 }
 0x13f   : > { %1081 = vmatmul.mubr.bf16.gmra.mrb[20].mxu0 %v294_v60 }
 0x140   : > { %1090 = vmatprep.mubr.bf16.mxu0 %v3439_v40 }
 0x147   : > { %1091 = vmatmul.mubr.bf16.gmra.mrb[24].mxu0 %v297_v61 }
 0x148   : > { %1100 = vmatprep.mubr.bf16.mxu0 %v3439_v40 }
 0x14f   : > { %1101 = vmatmul.mubr.bf16.gmra.mrb[28].mxu0 %v300_v2 }
 0x150   : > { %1110 = vmatprep.mubr.bf16.mxu0 %v3439_v40 }
 0x152   : > { %v2588_v25 = vpop.f32.mrb[0].mxu1 }
 0x153   : > { %v2589_v26 = vpop.f32.mrb[1].mxu1 }
 0x154   : > { %v2591_v27 = vpop.f32.mrb[2].mxu1  ;;  %v3722_v28 = vadd.f32 %v2589_v26, %v2588_v25 }
 0x155   : > { %v2592_v29 = vpop.f32.mrb[3].mxu1 }
 0x156   : > { %v3725_v33 = vadd.f32 %v2592_v29, %v2591_v27 }
 0x157   : > { %1111 = vmatmul.mubr.bf16.gmra.mrb[32].mxu0 %v303_v3 }
 0x158   : > { %1120 = vmatprep.mubr.bf16.mxu0 %v3439_v40 }
 0x15a   : > { %v2594_v30 = vpop.f32.mrb[4].mxu1 }
 0x15b   : > { %v2595_v31 = vpop.f32.mrb[5].mxu1 }
 0x15c   : > { %v2597_v32 = vpop.f32.mrb[6].mxu1  ;;  %v3727_v34 = vadd.f32 %v2595_v31, %v2594_v30 }
 0x15d   : > { %v2598_v35 = vpop.f32.mrb[7].mxu1 }
 0x15e   : > { %v3729_v36 = vadd.f32 %v2598_v35, %v2597_v32 }
 0x15f   : > { %1121 = vmatmul.mubr.bf16.gmra.mrb[36].mxu0 %v306_v8 }
 0x160   : > { %1130 = vmatprep.mubr.bf16.mxu0 %v3439_v40 }
 0x162   : > { %v2600_v37 = vpop.f32.mrb[8].mxu1 }
 0x163   : > { %v2601_v38 = vpop.f32.mrb[9].mxu1 }
 0x164   : > { %v2603_v39 = vpop.f32.mrb[10].mxu1  ;;  %v3731_v41 = vadd.f32 %v2601_v38, %v2600_v37 }
 0x165   : > { %v2604_v42 = vpop.f32.mrb[11].mxu1 }
 0x166   : > { %v3733_v46 = vadd.f32 %v2604_v42, %v2603_v39 }
 0x167   : > { %1131 = vmatmul.mubr.bf16.gmra.mrb[40].mxu0 %v309_v9 }
 0x168   : > { %1140 = vmatprep.mubr.bf16.mxu0 %v3439_v40 }
 0x16a   : > { %v2606_v43 = vpop.f32.mrb[12].mxu1 }
 0x16b   : > { %v2607_v44 = vpop.f32.mrb[13].mxu1 }
 0x16c   : > { %v2609_v45 = vpop.f32.mrb[14].mxu1 }
 0x16d   : > { %v2610_v47 = vpop.f32.mrb[15].mxu1 }
 0x16e   : > { %v3737_v48 = vadd.f32 %v2610_v47, %v2609_v45 }
 0x16f   : > { %1141 = vmatmul.mubr.bf16.gmra.mrb[44].mxu0 %v312_v14 }
 0x170   : > { %1150 = vmatprep.mubr.bf16.mxu0 %v3439_v40 }
 0x172   : > { %v2612_v49 = vpop.f32.mrb[16].mxu1 }
 0x173   : > { %v2613_v50 = vpop.f32.mrb[17].mxu1 }
 0x174   : > { %v2615_v51 = vpop.f32.mrb[18].mxu1  ;;  %v3739_v52 = vadd.f32 %v2613_v50, %v2612_v49 }
 0x175   : > { %v2616_v53 = vpop.f32.mrb[19].mxu1 }
 0x176   : > { %v3741_v54 = vadd.f32 %v2616_v53, %v2615_v51 }
 0x177   : > { %1151 = vmatmul.mubr.bf16.gmra.mrb[48].mxu0 %v315_v15 }
 0x178   : > { %1160 = vmatprep.mubr.bf16.mxu0 %v3439_v40 }
 0x17a   : > { %v2618_v55 = vpop.f32.mrb[20].mxu1 }
 0x17b   : > { %v2619_v56 = vpop.f32.mrb[21].mxu1 }
 0x17c   : > { %v3743_v57 = vadd.f32 %v2619_v56, %v2618_v55  ;;  %v2621_v58 = vpop.f32.mrb[22].mxu1 }
 0x17d   : > { %v2622_v59 = vpop.f32.mrb[23].mxu1 }
 0x17e   : > { %v3745_v60 = vadd.f32 %v2622_v59, %v2621_v58 }
 0x17f   : > { %1161 = vmatmul.mubr.bf16.gmra.mrb[52].mxu0 %v318_v20 }
 0x180   : > { %1170 = vmatprep.mubr.bf16.mxu0 %v3439_v40 }
 0x182   : > { %v2624_v61 = vpop.f32.mrb[24].mxu1 }
 0x183   : > { %v2625_v62 = vpop.f32.mrb[25].mxu1 }
 0x184   : > { %v3747_v63 = vadd.f32 %v2625_v62, %v2624_v61  ;;  %v2627_v0 = vpop.f32.mrb[26].mxu1 }
 0x185   : > { %v2628_v1 = vpop.f32.mrb[27].mxu1 }
 0x186   : > { %v3749_v2 = vadd.f32 %v2628_v1, %v2627_v0 }
 0x187   : > { %1171 = vmatmul.mubr.bf16.gmra.mrb[56].mxu0 %v321_v21 }
 0x188   : > { %1180 = vmatprep.mubr.bf16.mxu0 %v3439_v40  ;;  %v3735_v40 = vadd.f32 %v2607_v44, %v2606_v43 }
 0x18a   : > { %v2630_v3 = vpop.f32.mrb[28].mxu1 }
 0x18b   : > { %v2631_v4 = vpop.f32.mrb[29].mxu1 }
 0x18c   : > { %v3751_v5 = vadd.f32 %v2631_v4, %v2630_v3  ;;  %v2633_v6 = vpop.f32.mrb[30].mxu1 }
 0x18d   : > { %v2634_v7 = vpop.f32.mrb[31].mxu1 }
 0x18e   : > { %v3753_v8 = vadd.f32 %v2634_v7, %v2633_v6 }
 0x18f   : > { %1181 = vmatmul.mubr.bf16.gmra.mrb[60].mxu0 %v324_v24 }
 0x192   : > { %v2636_v9 = vpop.f32.mrb[32].mxu1 }
 0x193   : > { %v2637_v10 = vpop.f32.mrb[33].mxu1 }
 0x194   : > { %v3755_v11 = vadd.f32 %v2637_v10, %v2636_v9  ;;  %v2639_v12 = vpop.f32.mrb[34].mxu1 }
 0x195   : > { %v2640_v13 = vpop.f32.mrb[35].mxu1 }
 0x196   : > { %v3757_v14 = vadd.f32 %v2640_v13, %v2639_v12 }
 0x19a   : > { %v2642_v15 = vpop.f32.mrb[36].mxu1 }
 0x19b   : > { %v2643_v16 = vpop.f32.mrb[37].mxu1 }
 0x19c   : > { %v3759_v17 = vadd.f32 %v2643_v16, %v2642_v15  ;;  %v2645_v18 = vpop.f32.mrb[38].mxu1 }
 0x19d   : > { %v2646_v19 = vpop.f32.mrb[39].mxu1 }
 0x19e   : > { %v3761_v20 = vadd.f32 %v2646_v19, %v2645_v18 }
 0x1a2   : > { %v2648_v21 = vpop.f32.mrb[40].mxu1 }
 0x1a3   : > { %v2649_v22 = vpop.f32.mrb[41].mxu1 }
 0x1a4   : > { %v3763_v23 = vadd.f32 %v2649_v22, %v2648_v21  ;;  %v2651_v24 = vpop.f32.mrb[42].mxu1 }
 0x1a5   : > { %v2652_v25 = vpop.f32.mrb[43].mxu1 }
 0x1a6   : > { %v3765_v26 = vadd.f32 %v2652_v25, %v2651_v24 }
 0x1aa   : > { %v2654_v27 = vpop.f32.mrb[44].mxu1 }
 0x1ab   : > { %v2655_v29 = vpop.f32.mrb[45].mxu1 }
 0x1ac   : > { %v3767_v30 = vadd.f32 %v2655_v29, %v2654_v27  ;;  %v2657_v31 = vpop.f32.mrb[46].mxu1 }
 0x1ad   : > { %v2658_v32 = vpop.f32.mrb[47].mxu1 }
 0x1ae   : > { %v3769_v35 = vadd.f32 %v2658_v32, %v2657_v31 }
 0x1b2   : > { %v2660_v37 = vpop.f32.mrb[48].mxu1 }
 0x1b3   : > { %v2661_v38 = vpop.f32.mrb[49].mxu1 }
 0x1b4   : > { %v3771_v39 = vadd.f32 %v2661_v38, %v2660_v37  ;;  %v2663_v42 = vpop.f32.mrb[50].mxu1 }
 0x1b5   : > { %v2664_v43 = vpop.f32.mrb[51].mxu1 }
 0x1b6   : > { %v3773_v44 = vadd.f32 %v2664_v43, %v2663_v42 }
 0x1ba   : > { %v2666_v45 = vpop.f32.mrb[52].mxu1 }
 0x1bb   : > { %v2667_v47 = vpop.f32.mrb[53].mxu1 }
 0x1bc   : > { %v3775_v49 = vadd.f32 %v2667_v47, %v2666_v45  ;;  %v2669_v50 = vpop.f32.mrb[54].mxu1 }
 0x1bd   : > { %v2670_v51 = vpop.f32.mrb[55].mxu1 }
 0x1be   : > { %v3777_v53 = vadd.f32 %v2670_v51, %v2669_v50 }
 0x1c2   : > { %v2672_v55 = vpop.f32.mrb[56].mxu1 }
 0x1c3   : > { %v2673_v56 = vpop.f32.mrb[57].mxu1 }
 0x1c4   : > { %v3779_v58 = vadd.f32 %v2673_v56, %v2672_v55  ;;  %v2675_v59 = vpop.f32.mrb[58].mxu1 }
 0x1c5   : > { %v2676_v61 = vpop.f32.mrb[59].mxu1 }
 0x1c6   : > { %v3781_v62 = vadd.f32 %v2676_v61, %v2675_v59 }
 0x1ca   : > { %v2678_v0 = vpop.f32.mrb[60].mxu1 }
 0x1cb   : > { %v2679_v1 = vpop.f32.mrb[61].mxu1 }
 0x1cc   : > { %v3783_v4 = vadd.f32 %v2679_v1, %v2678_v0  ;;  %v2681_v6 = vpop.f32.mrb[62].mxu1 }
 0x1cd   : > { %v2682_v9 = vpop.f32.mrb[63].mxu1 }
 0x1ce   : > { %v3785_v12 = vadd.f32 %v2682_v9, %v2681_v6 }
 0x1d2   : > { %v2790_v21 = vpop.f32.mrb[64].mxu1 }
 0x1d3   : > { %v1395_v22 = vadd.f32 %v2790_v21, %v3727_v34  ;;  %v1386_v24 = vpop.f32.mrb[65].mxu1 }
 0x1d4   : > { %v1387_v27 = vadd.f32 %v3722_v28, %v1386_v24  ;;  %v2791_v29 = vpop.f32.mrb[66].mxu1 }
 0x1d5   : > { %v1398_v32 = vadd.f32 %v2791_v29, %v3729_v36  ;;  %v1389_v37 = vpop.f32.mrb[67].mxu1 }
 0x1d6   : > { %v1390_v42 = vadd.f32 %v3725_v33, %v1389_v37 }
 0x1d7   : > { %v1578_v47 = vpack.c.bf16 %v1398_v32, %v1395_v22 }
 0x1d8   : > { %v1577_v34 = vpack.c.bf16 %v1390_v42, %v1387_v27 }
 0x1da   : > { %2884 = vmatprep.subr.bf16.mxu0 %v1577_v34  ;;  %v2794_v55 = vpop.f32.mrb[68].mxu1 }
 0x1db   : > { %2885 = vmatpush3.bf16.msra.mxu0 %v1577_v34  ;;  %v1411_v36 = vadd.f32 %v2794_v55, %v3735_v40  ;;  %v1402_v56 = vpop.f32.mrb[69].mxu1 }
 0x1dc   : > { %2886 = vmatprep.subr.bf16.mxu0 %v1578_v47  ;;  %v1403_v59 = vadd.f32 %v3731_v41, %v1402_v56  ;;  %v2795_v61 = vpop.f32.mrb[70].mxu1 }
 0x1dd   : > { %v1414_v1 = vadd.f32 %v2795_v61, %v3737_v48 }
 0x1df   : > { %2887 = vmatpush3.bf16.msra.mxu0 %v1578_v47 }
 0x1ea   : > { %v1032_v3 = vpop.f32.mrb[0].mxu0 }
 0x1eb   : > { %v1034_v7 = vpop.f32.mrb[1].mxu0 }
 0x1ec   : > { %v1036_v10 = vpop.f32.mrb[2].mxu0  ;;  %v1513_v16 = vmul.f32 0.125, %v1034_v7 }
 0x1ed   : > { %v1545_v13 = vpack.c.bf16 %v1036_v10, %v1032_v3  ;;  %v1038_v15 = vpop.f32.mrb[3].mxu0  ;;  %v1405_v3 = vpop.f32.mrb[71].mxu1 }
 0x1ee   : > { %v1514_v18 = vmul.f32 0.125, %v1038_v15  ;;  %v1406_v7 = vadd.f32 %v3733_v46, %v1405_v3  ;;  %v2798_v48 = vpop.f32.mrb[72].mxu1 }
 0x1ef   : > { %2820 = vmatprep.subr.bf16.mxu1 %v1545_v13  ;;  %v1418_v46 = vpop.f32.mrb[73].mxu1 }
 0x1f0   : > { %v1561_v19 = vpack.c.bf16 %v1514_v18, %v1513_v16  ;;  %2821 = vmatpush3.bf16.xpose.msra.mxu1 %v1545_v13  ;;  %v1580_v13 = vpack.c.bf16 %v1414_v1, %v1411_v36  ;;  %v1579_v16 = vpack.c.bf16 %v1406_v7, %v1403_v59  ;;  %v1427_v18 = vadd.f32 %v2798_v48, %v3743_v57  ;;  %v2799_v22 = vpop.f32.mrb[74].mxu1 }
 0x1f1   : > { %v1419_v21 = vadd.f32 %v3739_v52, %v1418_v46  ;;  %v1421_v27 = vpop.f32.mrb[75].mxu1 }
 0x1f2   : > { %v1042_v25 = vpop.f32.mrb[4].mxu0  ;;  %2836 = vmatprep.mubr.bf16.mxu1 %v1561_v19  ;;  %2888 = vmatprep.subr.bf16.mxu0 %v1579_v16 }
 0x1f3   : > { %v1044_v31 = vpop.f32.mrb[5].mxu0  ;;  %2889 = vmatpush3.bf16.msra.mxu0 %v1579_v16 }
 0x1f4   : > { %v1046_v38 = vpop.f32.mrb[6].mxu0  ;;  %v3791_v50 = vmul.f32 0.125, %v1044_v31  ;;  %2890 = vmatprep.subr.bf16.mxu0 %v1580_v13  ;;  %v1422_v31 = vadd.f32 %v3741_v54, %v1421_v27 }
 0x1f5   : > { %v1546_v43 = vpack.c.bf16 %v1046_v38, %v1042_v25  ;;  %v1048_v45 = vpop.f32.mrb[7].mxu0  ;;  %v1430_v25 = vadd.f32 %v2799_v22, %v3745_v60  ;;  %v2802_v60 = vpop.f32.mrb[76].mxu1 }
 0x1f6   : > { %v3793_v51 = vmul.f32 0.125, %v1048_v45  ;;  %v1443_v45 = vadd.f32 %v2802_v60, %v3751_v5  ;;  %v1434_v54 = vpop.f32.mrb[77].mxu1 }
 0x1f7   : > { %2822 = vmatprep.subr.bf16.mxu1 %v1546_v43  ;;  %2891 = vmatpush3.bf16.msra.mxu0 %v1580_v13  ;;  %v1582_v38 = vpack.c.bf16 %v1430_v25, %v1427_v18  ;;  %v1435_v34 = vadd.f32 %v3747_v63, %v1434_v54  ;;  %v2803_v55 = vpop.f32.mrb[78].mxu1 }
 0x1f8   : > { %v1562_v28 = vpack.c.bf16 %v3793_v51, %v3791_v50  ;;  %2823 = vmatpush3.bf16.xpose.msra.mxu1 %v1546_v43  ;;  %v1581_v43 = vpack.c.bf16 %v1422_v31, %v1419_v21  ;;  %v1446_v56 = vadd.f32 %v2803_v55, %v3753_v8 }
 0x1fa   : > { %v1052_v33 = vpop.f32.mrb[8].mxu0  ;;  %2892 = vmatprep.subr.bf16.mxu0 %v1581_v43  ;;  %v1584_v3 = vpack.c.bf16 %v1446_v56, %v1443_v45 }
 0x1fb   : > { %v1054_v0 = vpop.f32.mrb[9].mxu0  ;;  %2893 = vmatpush3.bf16.msra.mxu0 %v1581_v43 }
 0x1fc   : > { %v1056_v6 = vpop.f32.mrb[10].mxu0  ;;  %v3801_v15 = vmul.f32 0.125, %v1054_v0  ;;  %2894 = vmatprep.subr.bf16.mxu0 %v1582_v38 }
 0x1fd   : > { %v1547_v9 = vpack.c.bf16 %v1056_v6, %v1052_v33  ;;  %v1058_v10 = vpop.f32.mrb[11].mxu0  ;;  %v1437_v33 = vpop.f32.mrb[79].mxu1 }
 0x1fe   : > { %v3803_v40 = vmul.f32 0.125, %v1058_v10  ;;  %v1438_v61 = vadd.f32 %v3749_v2, %v1437_v33  ;;  %v2806_v8 = vpop.f32.mrb[80].mxu1 }
 0x1ff   : > { %2824 = vmatprep.subr.bf16.mxu1 %v1547_v9  ;;  %2895 = vmatpush3.bf16.msra.mxu0 %v1582_v38  ;;  %v1450_v2 = vpop.f32.mrb[81].mxu1 }
 0x200   : > { %v1563_v41 = vpack.c.bf16 %v3803_v40, %v3801_v15  ;;  %2825 = vmatpush3.bf16.xpose.msra.mxu1 %v1547_v9  ;;  %v1583_v7 = vpack.c.bf16 %v1438_v61, %v1435_v34  ;;  %v1459_v9 = vadd.f32 %v2806_v8, %v3759_v17  ;;  %v1451_v13 = vadd.f32 %v3755_v11, %v1450_v2  ;;  %v2807_v16 = vpop.f32.mrb[82].mxu1 }
 0x201   : > { %v1462_v18 = vadd.f32 %v2807_v16, %v3761_v20  ;;  %v1453_v46 = vpop.f32.mrb[83].mxu1 }
 0x202   : > { %v1062_v19 = vpop.f32.mrb[12].mxu0  ;;  %2896 = vmatprep.subr.bf16.mxu0 %v1583_v7  ;;  %v1454_v21 = vadd.f32 %v3757_v14, %v1453_v46  ;;  %v2810_v20 = vpop.f32.mrb[84].mxu1 }
 0x203   : > { %v1064_v24 = vpop.f32.mrb[13].mxu0  ;;  %2897 = vmatpush3.bf16.msra.mxu0 %v1583_v7  ;;  %v3831_v25 = vpack.c.bf16 %v1462_v18, %v1459_v9  ;;  %v1475_v31 = vadd.f32 %v2810_v20, %v3767_v30  ;;  %v1466_v14 = vpop.f32.mrb[85].mxu1 }
 0x204   : > { %v1066_v29 = vpop.f32.mrb[14].mxu0  ;;  %v3811_v42 = vmul.f32 0.125, %v1064_v24  ;;  %2898 = vmatprep.subr.bf16.mxu0 %v1584_v3  ;;  %v2811_v38 = vpop.f32.mrb[86].mxu1 }
 0x205   : > { %v1548_v32 = vpack.c.bf16 %v1066_v29, %v1062_v19  ;;  %v1068_v37 = vpop.f32.mrb[15].mxu0  ;;  %v3837_v29 = vpack.c.bf16 %v1454_v21, %v1451_v13  ;;  %v1478_v60 = vadd.f32 %v2811_v38, %v3769_v35  ;;  %v1469_v45 = vpop.f32.mrb[87].mxu1 }
 0x206   : > { %v3813_v57 = vmul.f32 0.125, %v1068_v37  ;;  %v1467_v37 = vadd.f32 %v3763_v23, %v1466_v14  ;;  %v2814_v35 = vpop.f32.mrb[88].mxu1 }
 0x207   : > { %2826 = vmatprep.subr.bf16.mxu1 %v1548_v32  ;;  %2899 = vmatpush3.bf16.msra.mxu0 %v1584_v3  ;;  %v1482_v61 = vpop.f32.mrb[89].mxu1 }
 0x208   : > { %v1564_v52 = vpack.c.bf16 %v3813_v57, %v3811_v42  ;;  %2827 = vmatpush3.bf16.xpose.msra.mxu1 %v1548_v32 }
 0x20a   : > { %v1072_v47 = vpop.f32.mrb[16].mxu0 }
 0x20b   : > { %v1074_v36 = vpop.f32.mrb[17].mxu0 }
 0x20c   : > { %v1076_v59 = vpop.f32.mrb[18].mxu0  ;;  %v3821_v6 = vmul.f32 0.125, %v1074_v36  ;;  %v3845_v36 = vpack.c.bf16 %v1478_v60, %v1475_v31 }
 0x20d   : > { %v1549_v0 = vpack.c.bf16 %v1076_v59, %v1072_v47  ;;  %v1078_v1 = vpop.f32.mrb[19].mxu0  ;;  %v1470_v47 = vadd.f32 %v3765_v26, %v1469_v45  ;;  %v1491_v59 = vadd.f32 %v2814_v35, %v3775_v49 }
 0x20e   : > { %v3823_v5 = vmul.f32 0.125, %v1078_v1  ;;  %v2815_v1 = vpop.f32.mrb[90].mxu1 }
 0x20f   : > { %2828 = vmatprep.subr.bf16.mxu1 %v1549_v0  ;;  %v3851_v30 = vpack.c.bf16 %v1470_v47, %v1467_v37  ;;  %v1494_v7 = vadd.f32 %v2815_v1, %v3777_v53  ;;  %v1485_v8 = vpop.f32.mrb[91].mxu1 }
 0x210   : > { %v1565_v63 = vpack.c.bf16 %v3823_v5, %v3821_v6  ;;  %2829 = vmatpush3.bf16.xpose.msra.mxu1 %v1549_v0  ;;  %v1483_v0 = vadd.f32 %v3771_v39, %v1482_v61  ;;  %v1486_v2 = vadd.f32 %v3773_v44, %v1485_v8  ;;  %v2818_v39 = vpop.f32.mrb[92].mxu1 }
 0x211   : > { %v3859_v16 = vpack.c.bf16 %v1494_v7, %v1491_v59  ;;  %v1498_v21 = vpop.f32.mrb[93].mxu1 }
 0x212   : > { %v1082_v10 = vpop.f32.mrb[20].mxu0  ;;  %v3861_v46 = vpack.c.bf16 %v1486_v2, %v1483_v0 }
 0x213   : > { %v1084_v48 = vpop.f32.mrb[21].mxu0 }
 0x214   : > { %v1086_v19 = vpop.f32.mrb[22].mxu0  ;;  %v3833_v27 = vmul.f32 0.125, %v1084_v48 }
 0x215   : > { %v1550_v22 = vpack.c.bf16 %v1086_v19, %v1082_v10  ;;  %v1088_v24 = vpop.f32.mrb[23].mxu0  ;;  %v1507_v19 = vadd.f32 %v2818_v39, %v3783_v4 }
 0x216   : > { %v3835_v17 = vmul.f32 0.125, %v1088_v24  ;;  %v2819_v24 = vpop.f32.mrb[94].mxu1 }
 0x217   : > { %2830 = vmatprep.subr.bf16.mxu1 %v1550_v22  ;;  %v1510_v20 = vadd.f32 %v2819_v24, %v3785_v12  ;;  %v1501_v31 = vpop.f32.mrb[95].mxu1 }
 0x218   : > { %v1566_v11 = vpack.c.bf16 %v3835_v17, %v3833_v27  ;;  %2831 = vmatpush3.bf16.xpose.msra.mxu1 %v1550_v22  ;;  %v1499_v22 = vadd.f32 %v3779_v58, %v1498_v21 }
 0x21a   : > { %v1092_v32 = vpop.f32.mrb[24].mxu0 }
 0x21b   : > { %v1094_v43 = vpop.f32.mrb[25].mxu0 }
 0x21c   : > { %v1096_v54 = vpop.f32.mrb[26].mxu0  ;;  %v3847_v56 = vmul.f32 0.125, %v1094_v43  ;;  %v3867_v43 = vpack.c.bf16 %v1510_v20, %v1507_v19 }
 0x21d   : > { %v1551_v34 = vpack.c.bf16 %v1096_v54, %v1092_v32  ;;  %v1098_v55 = vpop.f32.mrb[27].mxu0  ;;  %v1502_v32 = vadd.f32 %v3781_v62, %v1501_v31 }
 0x21e   : > { %v3849_v33 = vmul.f32 0.125, %v1098_v55 }
 0x21f   : > { %2832 = vmatprep.subr.bf16.mxu1 %v1551_v34  ;;  %v3869_v54 = vpack.c.bf16 %v1502_v32, %v1499_v22 }
 0x220   : > { %v1567_v23 = vpack.c.bf16 %v3849_v33, %v3847_v56  ;;  %2833 = vmatpush3.bf16.xpose.msra.mxu1 %v1551_v34 }
 0x222   : > { %v1102_v26 = vpop.f32.mrb[28].mxu0 }
 0x223   : > { %v1104_v3 = vpop.f32.mrb[29].mxu0 }
 0x224   : > { %v1106_v9 = vpop.f32.mrb[30].mxu0  ;;  %v1527_v48 = vmul.f32 0.125, %v1104_v3 }
 0x225   : > { %v1552_v10 = vpack.c.bf16 %v1106_v9, %v1102_v26  ;;  %v1108_v13 = vpop.f32.mrb[31].mxu0 }
 0x226   : > { %v1528_v18 = vmul.f32 0.125, %v1108_v13 }
 0x227   : > { %2834 = vmatprep.subr.bf16.mxu1 %v1552_v10 }
 0x228   : > { %v1568_v49 = vpack.c.bf16 %v1528_v18, %v1527_v48  ;;  %2835 = vmatpush3.bf16.xpose.msra.mxu1 %v1552_v10 }
 0x22a   : > { %v1112_v53 = vpop.f32.mrb[32].mxu0 }
 0x22b   : > { %v1114_v44 = vpop.f32.mrb[33].mxu0 }
 0x22c   : > { %v1116_v14 = vpop.f32.mrb[34].mxu0  ;;  %v1529_v60 = vmul.f32 0.125, %v1114_v44 }
 0x22d   : > { %v1553_v37 = vpack.c.bf16 %v1116_v14, %v1112_v53  ;;  %v1118_v38 = vpop.f32.mrb[35].mxu0 }
 0x22e   : > { %v1530_v45 = vmul.f32 0.125, %v1118_v38 }
 0x22f   : > { %2837 = vmatmul.mubr.bf16.vlgmr.msra.gmra.mrb[96].mxu1 %v1562_v28  ;;  %2852 = vmatprep.subr.bf16.mxu1 %v1553_v37 }
 0x230   : > { %v1569_v58 = vpack.c.bf16 %v1530_v45, %v1529_v60  ;;  %2840 = vmatprep.mubr.bf16.mxu1 %v1563_v41  ;;  %2853 = vmatpush3.bf16.xpose.msra.mxu1 %v1553_v37 }
 0x232   : > { %v1122_v62 = vpop.f32.mrb[36].mxu0 }
 0x233   : > { %v1124_v4 = vpop.f32.mrb[37].mxu0 }
 0x234   : > { %v1126_v12 = vpop.f32.mrb[38].mxu0  ;;  %v3877_v55 = vmul.f32 0.125, %v1124_v4 }
 0x235   : > { %v1554_v47 = vpack.c.bf16 %v1126_v12, %v1122_v62  ;;  %v1128_v34 = vpop.f32.mrb[39].mxu0 }
 0x236   : > { %v3879_v35 = vmul.f32 0.125, %v1128_v34 }
 0x237   : > { %2841 = vmatmul.mubr.bf16.gmra.mrb[100].mxu1 %v1564_v52  ;;  %2854 = vmatprep.subr.bf16.mxu1 %v1554_v47 }
 0x238   : > { %v1570_v50 = vpack.c.bf16 %v3879_v35, %v3877_v55  ;;  %2844 = vmatprep.mubr.bf16.mxu1 %v1565_v63  ;;  %2855 = vmatpush3.bf16.xpose.msra.mxu1 %v1554_v47 }
 0x23a   : > { %v1132_v51 = vpop.f32.mrb[40].mxu0 }
 0x23b   : > { %v1134_v28 = vpop.f32.mrb[41].mxu0 }
 0x23c   : > { %v1136_v15 = vpop.f32.mrb[42].mxu0  ;;  %v1533_v59 = vmul.f32 0.125, %v1134_v28 }
 0x23d   : > { %v1555_v40 = vpack.c.bf16 %v1136_v15, %v1132_v51  ;;  %v1138_v41 = vpop.f32.mrb[43].mxu0 }
 0x23e   : > { %v1534_v61 = vmul.f32 0.125, %v1138_v41 }
 0x23f   : > { %2845 = vmatmul.mubr.bf16.gmra.mrb[104].mxu1 %v1566_v11  ;;  %2856 = vmatprep.subr.bf16.mxu1 %v1555_v40 }
 0x240   : > { %v1571_v42 = vpack.c.bf16 %v1534_v61, %v1533_v59  ;;  %2848 = vmatprep.mubr.bf16.mxu1 %v1567_v23  ;;  %2857 = vmatpush3.bf16.xpose.msra.mxu1 %v1555_v40 }
 0x242   : > { %v1142_v57 = vpop.f32.mrb[44].mxu0 }
 0x243   : > { %v1144_v52 = vpop.f32.mrb[45].mxu0 }
 0x244   : > { %v1146_v6 = vpop.f32.mrb[46].mxu0  ;;  %v1535_v26 = vmul.f32 0.125, %v1144_v52 }
 0x245   : > { %v1556_v5 = vpack.c.bf16 %v1146_v6, %v1142_v57  ;;  %v1148_v63 = vpop.f32.mrb[47].mxu0 }
 0x246   : > { %v1536_v0 = vmul.f32 0.125, %v1148_v63 }
 0x247   : > { %2849 = vmatmul.mubr.bf16.gmra.mrb[108].mxu1 %v1568_v49  ;;  %2858 = vmatprep.subr.bf16.mxu1 %v1556_v5 }
 0x248   : > { %v1572_v1 = vpack.c.bf16 %v1536_v0, %v1535_v26  ;;  %2859 = vmatpush3.bf16.xpose.msra.mxu1 %v1556_v5  ;;  %2868 = vmatprep.mubr.bf16.mxu1 %v1569_v58 }
 0x24a   : > { %v1152_v27 = vpop.f32.mrb[48].mxu0 }
 0x24b   : > { %v1154_v17 = vpop.f32.mrb[49].mxu0 }
 0x24c   : > { %v1156_v11 = vpop.f32.mrb[50].mxu0  ;;  %v1537_v56 = vmul.f32 0.125, %v1154_v17 }
 0x24d   : > { %v1557_v3 = vpack.c.bf16 %v1156_v11, %v1152_v27  ;;  %v1158_v7 = vpop.f32.mrb[51].mxu0 }
 0x24e   : > { %v1538_v33 = vmul.f32 0.125, %v1158_v7 }
 0x24f   : > { %2860 = vmatprep.subr.bf16.mxu1 %v1557_v3 }
 0x250   : > { %v1573_v23 = vpack.c.bf16 %v1538_v33, %v1537_v56  ;;  %2861 = vmatpush3.bf16.xpose.msra.mxu1 %v1557_v3 }
 0x252   : > { %v1162_v8 = vpop.f32.mrb[52].mxu0 }
 0x253   : > { %v1164_v9 = vpop.f32.mrb[53].mxu0 }
 0x254   : > { %v1166_v2 = vpop.f32.mrb[54].mxu0  ;;  %v1539_v48 = vmul.f32 0.125, %v1164_v9 }
 0x255   : > { %v1558_v10 = vpack.c.bf16 %v1166_v2, %v1162_v8  ;;  %v1168_v13 = vpop.f32.mrb[55].mxu0 }
 0x256   : > { %v1540_v18 = vmul.f32 0.125, %v1168_v13 }
 0x257   : > { %2862 = vmatprep.subr.bf16.mxu1 %v1558_v10 }
 0x258   : > { %v1574_v49 = vpack.c.bf16 %v1540_v18, %v1539_v48  ;;  %2863 = vmatpush3.bf16.xpose.msra.mxu1 %v1558_v10 }
 0x25a   : > { %v1172_v39 = vpop.f32.mrb[56].mxu0 }
 0x25b   : > { %v1174_v19 = vpop.f32.mrb[57].mxu0 }
 0x25c   : > { %v1176_v21 = vpop.f32.mrb[58].mxu0  ;;  %v1541_v24 = vmul.f32 0.125, %v1174_v19 }
 0x25d   : > { %v1559_v53 = vpack.c.bf16 %v1176_v21, %v1172_v39  ;;  %v1178_v22 = vpop.f32.mrb[59].mxu0 }
 0x25e   : > { %v1542_v44 = vmul.f32 0.125, %v1178_v22 }
 0x25f   : > { %2864 = vmatprep.subr.bf16.mxu1 %v1559_v53 }
 0x260   : > { %v1575_v20 = vpack.c.bf16 %v1542_v44, %v1541_v24  ;;  %2865 = vmatpush3.bf16.xpose.msra.mxu1 %v1559_v53 }
 0x262   : > { %v1182_v31 = vpop.f32.mrb[60].mxu0 }
 0x263   : > { %v1184_v14 = vpop.f32.mrb[61].mxu0 }
 0x264   : > { %v1186_v32 = vpop.f32.mrb[62].mxu0  ;;  %v1543_v60 = vmul.f32 0.125, %v1184_v14 }
 0x265   : > { %v1560_v37 = vpack.c.bf16 %v1186_v32, %v1182_v31  ;;  %v1188_v38 = vpop.f32.mrb[63].mxu0 }
 0x266   : > { %v1544_v45 = vmul.f32 0.125, %v1188_v38 }
 0x267   : > { %2866 = vmatprep.subr.bf16.mxu1 %v1560_v37 }
 0x268   : > { %v1576_v58 = vpack.c.bf16 %v1544_v45, %v1543_v60  ;;  %2867 = vmatpush3.bf16.xpose.msra.mxu1 %v1560_v37 }
 0x269   : > { %2916 = vmatprep.subr.bf16.mxu1 %v3837_v29 }
 0x26f   : > { %2869 = vmatmul.mubr.bf16.vlgmr.msra.gmra.mrb[112].mxu1 %v1570_v50 }
 0x270   : > { %2872 = vmatprep.mubr.bf16.mxu1 %v1571_v42  ;;  %2917 = vmatpush3.bf16.msra.mxu1 %v3837_v29 }
 0x271   : > { %2918 = vmatprep.subr.bf16.mxu1 %v3831_v25 }
 0x274   : > { %2919 = vmatpush3.bf16.msra.mxu1 %v3831_v25  ;;  %v1787_v25 = vlaneseq }
 0x275   : > { %2920 = vmatprep.subr.bf16.mxu1 %v3851_v30 }
 0x276   : > { %v3914_v29 = vshrl.u32 %v1787_v25, 7 }
 0x277   : > { %2873 = vmatmul.mubr.bf16.gmra.mrb[116].mxu1 %v1572_v1 }
 0x278   : > { %2876 = vmatprep.mubr.bf16.mxu1 %v1573_v23  ;;  %2921 = vmatpush3.bf16.msra.mxu1 %v3851_v30  ;;  %v3919_v30 = vadd.s32 112, %v3914_v29  ;;  %v3947_v47 = vadd.s32 8, %v3914_v29  ;;  %v3956_v35 = vadd.s32 56, %v3914_v29  ;;  %v3967_v51 = vadd.s32 48, %v3914_v29 }
 0x279   : > { %2922 = vmatprep.subr.bf16.mxu1 %v3845_v36  ;;  %v3972_v15 = vadd.s32 40, %v3914_v29  ;;  %v3983_v61 = vadd.s32 32, %v3914_v29  ;;  %v3994_v52 = vadd.s32 88, %v3914_v29  ;;  %v4005_v5 = vadd.s32 80, %v3914_v29 }
 0x27a   : > { %v4016_v0 = vadd.s32 72, %v3914_v29  ;;  %v1796_v11 = vadd.s32 64, %v3914_v29  ;;  %v4041_v33 = vadd.s32 104, %v3914_v29  ;;  %v1800_v23 = vadd.s32 96, %v3914_v29 }
 0x27c   : > { %2923 = vmatpush3.bf16.msra.mxu1 %v3845_v36  ;;  %v3916_v36 = vand.u32 127, %v1787_v25 }
 0x27d   : > { %2924 = vmatprep.subr.bf16.mxu1 %v3861_v46 }
 0x27e   : > { %vm1820_vm0 = vcmp.le.s32.totalorder %v3916_v36, %v3919_v30  ;;  %vm1806_vm4 = vcmp.le.s32.totalorder %v3916_v36, %v3914_v29  ;;  %vm1807_vm5 = vcmp.le.s32.totalorder %v3916_v36, %v3947_v47  ;;  %vm1813_vm6 = vcmp.le.s32.totalorder %v3916_v36, %v3956_v35 }
 0x27f   : > { %2877 = vmatmul.mubr.bf16.gmra.mrb[120].mxu1 %v1574_v49  ;;  %vm1812_vm7 = vcmp.le.s32.totalorder %v3916_v36, %v3967_v51  ;;  %vm1811_vm8 = vcmp.le.s32.totalorder %v3916_v36, %v3972_v15  ;;  %vm1810_vm9 = vcmp.le.s32.totalorder %v3916_v36, %v3983_v61  ;;  %vm1817_vm10 = vcmp.le.s32.totalorder %v3916_v36, %v3994_v52 }
 0x280   : > { %2880 = vmatprep.mubr.bf16.mxu1 %v1575_v20  ;;  %2925 = vmatpush3.bf16.msra.mxu1 %v3861_v46  ;;  %v3929_v46 = vadd.s32 16, %v3914_v29  ;;  %vm1816_vm11 = vcmp.le.s32.totalorder %v3916_v36, %v4005_v5  ;;  %vm1815_vm12 = vcmp.le.s32.totalorder %v3916_v36, %v4016_v0  ;;  %vm1814_vm13 = vcmp.le.s32.totalorder %v3916_v36, %v1796_v11 }
 0x281   : > { %2926 = vmatprep.subr.bf16.mxu1 %v3859_v16  ;;  %vm1819_vm14 = vcmp.le.s32.totalorder %v3916_v36, %v4041_v33  ;;  %vm1818_vm15 = vcmp.le.s32.totalorder %v3916_v36, %v1800_v23 }
 0x282   : > { %vm1808_vm2 = vcmp.le.s32.totalorder %v3916_v36, %v3929_v46 }
 0x284   : > { %2927 = vmatpush3.bf16.msra.mxu1 %v3859_v16  ;;  %v3924_v16 = vadd.s32 120, %v3914_v29 }
 0x285   : > { %2928 = vmatprep.subr.bf16.mxu1 %v3869_v54 }
 0x286   : > { %vm1821_vm1 = vcmp.le.s32.totalorder %v3916_v36, %v3924_v16 }
 0x287   : > { %2881 = vmatmul.mubr.bf16.gmra.mrb[124].mxu1 %v1576_v58 }
 0x288   : > { %2929 = vmatpush3.bf16.msra.mxu1 %v3869_v54 }
 0x289   : > { %2930 = vmatprep.subr.bf16.mxu1 %v3867_v43 }
 0x28c   : > { %2931 = vmatpush3.bf16.msra.mxu1 %v3867_v43  ;;  %v3932_v43 = vadd.s32 24, %v3914_v29 }
 0x28e   : > { %vm1809_vm3 = vcmp.le.s32.totalorder %v3916_v36, %v3932_v43 }
 0x302   : > { %v2838_v54 = vpop.f32.mrb[96].mxu1 }
 0x303   : > { %v1627_v62 = vpop.f32.mrb[97].mxu1  ;;  %v3941_v4 = vsel %vm1808_vm2, %v2838_v54, -inf }
 0x304   : > { %1858 = vmax.xlane.f32.xlu0 %v3941_v4  ;;  %v2839_v12 = vpop.f32.mrb[98].mxu1  ;;  %v3961_v50 = vsel %vm1806_vm4, %v1627_v62, -inf }
 0x305   : > { %v1630_v34 = vpop.f32.mrb[99].mxu1  ;;  %v3952_v55 = vsel %vm1809_vm3, %v2839_v12, -inf }
 0x306   : > { %1860 = vmax.xlane.f32.xlu1 %v3952_v55  ;;  %v3977_v41 = vsel %vm1807_vm5, %v1630_v34, -inf }
 0x308   : > { %1854 = vmax.xlane.f32.xlu0 %v3961_v50 }
 0x30a   : > { %v2842_v28 = vpop.f32.mrb[100].mxu1 }
 0x30b   : > { %v1643_v40 = vpop.f32.mrb[101].mxu1  ;;  %v3999_v6 = vsel %vm1812_vm7, %v2842_v28, -inf }
 0x30c   : > { %1856 = vmax.xlane.f32.xlu0 %v3977_v41  ;;  %v2843_v59 = vpop.f32.mrb[102].mxu1  ;;  %v4021_v27 = vsel %vm1810_vm9, %v1643_v40, -inf }
 0x30d   : > { %v1646_v42 = vpop.f32.mrb[103].mxu1  ;;  %v3988_v57 = vsel %vm1813_vm6, %v2843_v59, -inf }
 0x30e   : > { %1868 = vmax.xlane.f32.xlu1 %v3988_v57  ;;  %v4010_v63 = vsel %vm1811_vm8, %v1646_v42, -inf }
 0x310   : > { %1866 = vmax.xlane.f32.xlu0 %v3999_v6 }
 0x312   : > { %1864 = vmax.xlane.f32.xlu1 %v4010_v63  ;;  %v2846_v26 = vpop.f32.mrb[104].mxu1 }
 0x313   : > { %v1659_v1 = vpop.f32.mrb[105].mxu1  ;;  %v4038_v56 = vsel %vm1816_vm11, %v2846_v26, -inf }
 0x314   : > { %1862 = vmax.xlane.f32.xlu0 %v4021_v27  ;;  %v2847_v17 = vpop.f32.mrb[106].mxu1  ;;  %v4054_v10 = vsel %vm1814_vm13, %v1659_v1, -inf }
 0x315   : > { %v1662_v3 = vpop.f32.mrb[107].mxu1  ;;  %v4030_v7 = vsel %vm1817_vm10, %v2847_v17, -inf }
 0x316   : > { %1876 = vmax.xlane.f32.xlu1 %v4030_v7  ;;  %v4049_v8 = vsel %vm1815_vm12, %v1662_v3, -inf }
 0x318   : > { %1874 = vmax.xlane.f32.xlu0 %v4038_v56 }
 0x31a   : > { %1872 = vmax.xlane.f32.xlu1 %v4049_v8  ;;  %v2850_v9 = vpop.f32.mrb[108].mxu1 }
 0x31b   : > { %v1675_v2 = vpop.f32.mrb[109].mxu1  ;;  %v4061_v13 = vsel %vm1820_vm0, %v2850_v9, -inf }
 0x31c   : > { %1870 = vmax.xlane.f32.xlu0 %v4054_v10  ;;  %v2851_v48 = vpop.f32.mrb[110].mxu1  ;;  %v4078_v19 = vsel %vm1818_vm15, %v1675_v2, -inf }
 0x31d   : > { %v1678_v18 = vpop.f32.mrb[111].mxu1  ;;  %v4068_v49 = vsel %vm1821_vm1, %v2851_v48, -inf }
 0x31e   : > { %v4073_v39 = vsel %vm1819_vm14, %v1678_v18, -inf }
 0x31f   : > { %1880 = vmax.xlane.f32.xlu1 %v4073_v39 }
 0x320   : > { %1878 = vmax.xlane.f32.xlu0 %v4078_v19 }
 0x342   : > { %v2870_v21 = vpop.f32.mrb[112].mxu1 }
 0x343   : > { %v1724_v53 = vpop.f32.mrb[113].mxu1  ;;  %v4084_v22 = vsel %vm1808_vm2, %v2870_v21, -inf }
 0x344   : > { %1890 = vmax.xlane.f32.xlu0 %v4084_v22  ;;  %v2871_v24 = vpop.f32.mrb[114].mxu1  ;;  %v4090_v44 = vsel %vm1806_vm4, %v1724_v53, -inf }
 0x345   : > { %1886 = vmax.xlane.f32.xlu1 %v4090_v44  ;;  %v1727_v20 = vpop.f32.mrb[115].mxu1  ;;  %v4096_v31 = vsel %vm1809_vm3, %v2871_v24, -inf }
 0x346   : > { %v4101_v14 = vsel %vm1807_vm5, %v1727_v20, -inf }
 0x349   : > { %1892 = vmax.xlane.f32.xlu1 %v4096_v31 }
 0x34a   : > { %v2874_v32 = vpop.f32.mrb[116].mxu1 }
 0x34b   : > { %v1740_v37 = vpop.f32.mrb[117].mxu1  ;;  %v4107_v38 = vsel %vm1812_vm7, %v2874_v32, -inf }
 0x34c   : > { %1898 = vmax.xlane.f32.xlu0 %v4107_v38  ;;  %v2875_v60 = vpop.f32.mrb[118].mxu1  ;;  %v4124_v29 = vsel %vm1810_vm9, %v1740_v37, -inf }
 0x34d   : > { %1888 = vmax.xlane.f32.xlu1 %v4101_v14  ;;  %v1743_v45 = vpop.f32.mrb[119].mxu1  ;;  %v4114_v58 = vsel %vm1813_vm6, %v2875_v60, -inf }
 0x34e   : > { %v4119_v25 = vsel %vm1811_vm8, %v1743_v45, -inf }
 0x350   : > { %1894 = vmax.xlane.f32.xlu0 %v4124_v29 }
 0x351   : > { %1900 = vmax.xlane.f32.xlu1 %v4114_v58 }
 0x352   : > { %v2878_v46 = vpop.f32.mrb[120].mxu1 }
 0x353   : > { %v1756_v43 = vpop.f32.mrb[121].mxu1  ;;  %v4131_v54 = vsel %vm1816_vm11, %v2878_v46, -inf }
 0x354   : > { %1906 = vmax.xlane.f32.xlu0 %v4131_v54  ;;  %v2879_v62 = vpop.f32.mrb[122].mxu1  ;;  %v4147_v35 = vsel %vm1814_vm13, %v1756_v43, -inf }
 0x355   : > { %1896 = vmax.xlane.f32.xlu1 %v4119_v25  ;;  %v1759_v12 = vpop.f32.mrb[123].mxu1  ;;  %v4138_v47 = vsel %vm1817_vm10, %v2879_v62, -inf }
 0x356   : > { %v4143_v34 = vsel %vm1815_vm12, %v1759_v12, -inf }
 0x358   : > { %1902 = vmax.xlane.f32.xlu0 %v4147_v35 }
 0x359   : > { %1908 = vmax.xlane.f32.xlu1 %v4138_v47 }
 0x35a   : > { %v2882_v51 = vpop.f32.mrb[124].mxu1 }
 0x35b   : > { %v1772_v28 = vpop.f32.mrb[125].mxu1  ;;  %v4154_v15 = vsel %vm1820_vm0, %v2882_v51, -inf }
 0x35c   : > { %1882 = vmax.xlane.f32.xlu0 %v4061_v13  ;;  %v2883_v40 = vpop.f32.mrb[126].mxu1  ;;  %v4159_v59 = vsel %vm1818_vm15, %v1772_v28, -inf }
 0x35d   : > { %1904 = vmax.xlane.f32.xlu1 %v4143_v34  ;;  %v1775_v61 = vpop.f32.mrb[127].mxu1  ;;  %v4165_v42 = vsel %vm1821_vm1, %v2883_v40, -inf }
 0x35e   : > { %v4170_v30 = vsel %vm1819_vm14, %v1775_v61, -inf }
 0x360   : > { %1910 = vmax.xlane.f32.xlu0 %v4159_v59 }
 0x361   : > { %1884 = vmax.xlane.f32.xlu1 %v4068_v49 }
 0x364   : > { %1914 = vmax.xlane.f32.xlu0 %v4154_v15 }
 0x365   : > { %1912 = vmax.xlane.f32.xlu1 %v4170_v30 }
 0x369   : > { %1916 = vmax.xlane.f32.xlu1 %v4165_v42 }
 0x391   : > { %v1859_v52 = vpop.xlane.xlu0 %1858 }
 0x392   : > { %v1920_v16 = vsub.f32 %v3941_v4, %v1859_v52 }
 0x393   : > { %v1861_v5 = vpop.xlane.xlu1 %1860 }
 0x394   : > { %v1954_v26 = vmul.f32 1.442695, %v1920_v16  ;;  %v1921_v0 = vsub.f32 %v3952_v55, %v1861_v5 }
 0x395   : > { %v1855_v36 = vpop.xlane.xlu0 %1854 }
 0x396   : > { %3175 = vpow2.f32 %v1954_v26  ;;  %v1956_v1 = vmul.f32 1.442695, %v1921_v0  ;;  %v1918_v17 = vsub.f32 %v3961_v50, %v1855_v36 }
 0x398   : > { %3177 = vpow2.f32 %v1956_v1  ;;  %v1950_v11 = vmul.f32 1.442695, %v1918_v17 }
 0x399   : > { %v1857_v3 = vpop.xlane.xlu0 %1856 }
 0x39a   : > { %3179 = vpow2.f32 %v1950_v11  ;;  %v1919_v33 = vsub.f32 %v3977_v41, %v1857_v3 }
 0x39b   : > { %v1869_v23 = vpop.xlane.xlu1 %1868 }
 0x39c   : > { %v1952_v9 = vmul.f32 1.442695, %v1919_v33  ;;  %v1925_v2 = vsub.f32 %v3988_v57, %v1869_v23 }
 0x39d   : > { %v1867_v4 = vpop.xlane.xlu0 %1866 }
 0x39e   : > { %3181 = vpow2.f32 %v1952_v9  ;;  %v1964_v48 = vmul.f32 1.442695, %v1925_v2  ;;  %v1924_v55 = vsub.f32 %v3999_v6, %v1867_v4 }
 0x39f   : > { %v1865_v18 = vpop.xlane.xlu1 %1864 }
 0x3a0   : > { %v4183_v21 = vpop.eup %3175  ;;  %v1962_v53 = vmul.f32 1.442695, %v1924_v55  ;;  %v1923_v50 = vsub.f32 %v4010_v63, %v1865_v18  ;;  %3183 = vpow2.f32 %v1964_v48 }
 0x3a1   : > { %v1863_v24 = vpop.xlane.xlu0 %1862  ;;  %2018 = vadd.xlane.f32.xlu0 %v4183_v21 }
 0x3a2   : > { %v4187_v41 = vpop.eup %3177  ;;  %3185 = vpow2.f32 %v1962_v53  ;;  %v1960_v20 = vmul.f32 1.442695, %v1923_v50  ;;  %v1922_v57 = vsub.f32 %v4021_v27, %v1863_v24 }
 0x3a3   : > { %v1877_v32 = vpop.xlane.xlu1 %1876  ;;  %2020 = vadd.xlane.f32.xlu1 %v4187_v41 }
 0x3a4   : > { %v4191_v6 = vpop.eup %3179  ;;  %v1958_v37 = vmul.f32 1.442695, %v1922_v57  ;;  %v1929_v60 = vsub.f32 %v4030_v7, %v1877_v32  ;;  %3187 = vpow2.f32 %v1960_v20 }
 0x3a5   : > { %v1875_v63 = vpop.xlane.xlu0 %1874  ;;  %2014 = vadd.xlane.f32.xlu0 %v4191_v6 }
 0x3a6   : > { %3189 = vpow2.f32 %v1958_v37  ;;  %v1972_v45 = vmul.f32 1.442695, %v1929_v60  ;;  %v1928_v46 = vsub.f32 %v4038_v56, %v1875_v63 }
 0x3a7   : > { %v1873_v43 = vpop.xlane.xlu1 %1872 }
 0x3a8   : > { %v4196_v62 = vpop.eup %3181  ;;  %v1970_v27 = vmul.f32 1.442695, %v1928_v46  ;;  %v1927_v12 = vsub.f32 %v4049_v8, %v1873_v43  ;;  %3191 = vpow2.f32 %v1972_v45 }
 0x3a9   : > { %v1871_v51 = vpop.xlane.xlu0 %1870  ;;  %2016 = vadd.xlane.f32.xlu1 %v4196_v62 }
 0x3aa   : > { %3193 = vpow2.f32 %v1970_v27  ;;  %v1968_v7 = vmul.f32 1.442695, %v1927_v12  ;;  %v1926_v28 = vsub.f32 %v4054_v10, %v1871_v51  ;;  %v4201_v40 = vpop.eup %3183 }
 0x3ac   : > { %v4203_v61 = vpop.eup %3185  ;;  %v1966_v52 = vmul.f32 1.442695, %v1926_v28  ;;  %v1881_v56 = vpop.xlane.xlu1 %1880  ;;  %3195 = vpow2.f32 %v1968_v7 }
 0x3ad   : > { %v1931_v16 = vsub.f32 %v4073_v39, %v1881_v56  ;;  %v1879_v5 = vpop.xlane.xlu0 %1878  ;;  %2026 = vadd.xlane.f32.xlu0 %v4203_v61  ;;  %2028 = vadd.xlane.f32.xlu1 %v4201_v40 }
 0x3ae   : > { %3197 = vpow2.f32 %v1966_v52  ;;  %v1930_v8 = vsub.f32 %v4078_v19, %v1879_v5  ;;  %v4209_v26 = vpop.eup %3187 }
 0x3af   : > { %v1976_v10 = vmul.f32 1.442695, %v1931_v16 }
 0x3b0   : > { %v4211_v0 = vpop.eup %3189  ;;  %v1974_v36 = vmul.f32 1.442695, %v1930_v8 }
 0x3b1   : > { %3199 = vpow2.f32 %v1976_v10  ;;  %2022 = vadd.xlane.f32.xlu0 %v4211_v0  ;;  %2024 = vadd.xlane.f32.xlu1 %v4209_v26 }
 0x3b2   : > { %3201 = vpow2.f32 %v1974_v36  ;;  %v4215_v39 = vpop.eup %3191 }
 0x3b4   : > { %v4217_v1 = vpop.eup %3193 }
 0x3b5   : > { %2034 = vadd.xlane.f32.xlu0 %v4217_v1  ;;  %2036 = vadd.xlane.f32.xlu1 %v4215_v39 }
 0x3b6   : > { %v4221_v19 = vpop.eup %3195 }
 0x3b8   : > { %v4223_v17 = vpop.eup %3197 }
 0x3b9   : > { %2030 = vadd.xlane.f32.xlu0 %v4223_v17  ;;  %2032 = vadd.xlane.f32.xlu1 %v4221_v19 }
 0x3bb   : > { %v4227_v11 = vpop.eup %3199 }
 0x3bc   : > { %v4229_v3 = vpop.eup %3201 }
 0x3bd   : > { %2038 = vadd.xlane.f32.xlu0 %v4229_v3  ;;  %2040 = vadd.xlane.f32.xlu1 %v4227_v11 }
 0x3d1   : > { %v1891_v33 = vpop.xlane.xlu0 %1890 }
 0x3d2   : > { %v1936_v23 = vsub.f32 %v4084_v22, %v1891_v33  ;;  %v1887_v9 = vpop.xlane.xlu1 %1886 }
 0x3d3   : > { %v1934_v2 = vsub.f32 %v4090_v44, %v1887_v9 }
 0x3d4   : > { %v1986_v4 = vmul.f32 1.442695, %v1936_v23 }
 0x3d5   : > { %v1982_v48 = vmul.f32 1.442695, %v1934_v2 }
 0x3d6   : > { %3203 = vpow2.f32 %v1986_v4  ;;  %v1893_v55 = vpop.xlane.xlu1 %1892 }
 0x3d7   : > { %v1937_v18 = vsub.f32 %v4096_v31, %v1893_v55  ;;  %3205 = vpow2.f32 %v1982_v48 }
 0x3d9   : > { %v1988_v53 = vmul.f32 1.442695, %v1937_v18  ;;  %v1899_v50 = vpop.xlane.xlu0 %1898 }
 0x3da   : > { %v1940_v24 = vsub.f32 %v4107_v38, %v1899_v50  ;;  %v1889_v20 = vpop.xlane.xlu1 %1888 }
 0x3db   : > { %3207 = vpow2.f32 %v1988_v53  ;;  %v1935_v57 = vsub.f32 %v4101_v14, %v1889_v20 }
 0x3dc   : > { %v1994_v32 = vmul.f32 1.442695, %v1940_v24 }
 0x3dd   : > { %v1984_v22 = vmul.f32 1.442695, %v1935_v57  ;;  %v1895_v37 = vpop.xlane.xlu0 %1894 }
 0x3de   : > { %3209 = vpow2.f32 %v1994_v32  ;;  %v1938_v44 = vsub.f32 %v4124_v29, %v1895_v37  ;;  %v1901_v60 = vpop.xlane.xlu1 %1900 }
 0x3df   : > { %3211 = vpow2.f32 %v1984_v22  ;;  %v1941_v63 = vsub.f32 %v4114_v58, %v1901_v60 }
 0x3e0   : > { %v4240_v31 = vpop.eup %3203  ;;  %v1990_v45 = vmul.f32 1.442695, %v1938_v44 }
 0x3e1   : > { %v1996_v46 = vmul.f32 1.442695, %v1941_v63  ;;  %v1907_v43 = vpop.xlane.xlu0 %1906  ;;  %2050 = vadd.xlane.f32.xlu0 %v4240_v31  ;;  %v4245_v12 = vpop.eup %3205 }
 0x3e2   : > { %3213 = vpow2.f32 %v1990_v45  ;;  %v1944_v14 = vsub.f32 %v4131_v54, %v1907_v43  ;;  %v1897_v38 = vpop.xlane.xlu1 %1896 }
 0x3e3   : > { %3215 = vpow2.f32 %v1996_v46  ;;  %v1939_v27 = vsub.f32 %v4119_v25, %v1897_v38 }
 0x3e4   : > { %v2002_v29 = vmul.f32 1.442695, %v1944_v14 }
 0x3e5   : > { %v4247_v51 = vpop.eup %3207  ;;  %v1992_v58 = vmul.f32 1.442695, %v1939_v27  ;;  %v1903_v7 = vpop.xlane.xlu0 %1902  ;;  %2046 = vadd.xlane.f32.xlu0 %v4245_v12 }
 0x3e6   : > { %3217 = vpow2.f32 %v2002_v29  ;;  %v1942_v28 = vsub.f32 %v4147_v35, %v1903_v7  ;;  %v1909_v52 = vpop.xlane.xlu1 %1908  ;;  %2052 = vadd.xlane.f32.xlu1 %v4247_v51 }
 0x3e7   : > { %3219 = vpow2.f32 %v1992_v58  ;;  %v1945_v54 = vsub.f32 %v4138_v47, %v1909_v52 }
 0x3e8   : > { %v4253_v56 = vpop.eup %3209  ;;  %v1998_v25 = vmul.f32 1.442695, %v1942_v28 }
 0x3e9   : > { %v4255_v16 = vpop.eup %3211  ;;  %v2004_v5 = vmul.f32 1.442695, %v1945_v54  ;;  %v1883_v8 = vpop.xlane.xlu0 %1882  ;;  %2058 = vadd.xlane.f32.xlu0 %v4253_v56 }
 0x3ea   : > { %3221 = vpow2.f32 %v1998_v25  ;;  %v1932_v10 = vsub.f32 %v4061_v13, %v1883_v8  ;;  %v1905_v36 = vpop.xlane.xlu1 %1904  ;;  %2048 = vadd.xlane.f32.xlu1 %v4255_v16 }
 0x3eb   : > { %3223 = vpow2.f32 %v2004_v5  ;;  %v1943_v35 = vsub.f32 %v4143_v34, %v1905_v36 }
 0x3ec   : > { %v4261_v33 = vpop.eup %3213  ;;  %v1978_v47 = vmul.f32 1.442695, %v1932_v10 }
 0x3ed   : > { %v4263_v23 = vpop.eup %3215  ;;  %v2000_v9 = vmul.f32 1.442695, %v1943_v35  ;;  %2054 = vadd.xlane.f32.xlu0 %v4261_v33  ;;  %v1911_v2 = vpop.xlane.xlu0 %1910 }
 0x3ee   : > { %3225 = vpow2.f32 %v1978_v47  ;;  %v1946_v4 = vsub.f32 %v4159_v59, %v1911_v2  ;;  %v1885_v48 = vpop.xlane.xlu1 %1884  ;;  %2060 = vadd.xlane.f32.xlu1 %v4263_v23 }
 0x3ef   : > { %3227 = vpow2.f32 %v2000_v9  ;;  %v1933_v13 = vsub.f32 %v4068_v49, %v1885_v48 }
 0x3f0   : > { %v4269_v55 = vpop.eup %3217  ;;  %v2006_v34 = vmul.f32 1.442695, %v1946_v4 }
 0x3f1   : > { %v4271_v18 = vpop.eup %3219  ;;  %v1980_v53 = vmul.f32 1.442695, %v1933_v13  ;;  %2066 = vadd.xlane.f32.xlu0 %v4269_v55  ;;  %v1915_v50 = vpop.xlane.xlu0 %1914 }
 0x3f2   : > { %3229 = vpow2.f32 %v2006_v34  ;;  %v1948_v24 = vsub.f32 %v4154_v15, %v1915_v50  ;;  %2056 = vadd.xlane.f32.xlu1 %v4271_v18  ;;  %v1913_v59 = vpop.xlane.xlu1 %1912 }
 0x3f3   : > { %3231 = vpow2.f32 %v1980_v53  ;;  %v1947_v20 = vsub.f32 %v4170_v30, %v1913_v59 }
 0x3f4   : > { %v4277_v57 = vpop.eup %3221  ;;  %v2010_v49 = vmul.f32 1.442695, %v1948_v24 }
 0x3f5   : > { %v4279_v32 = vpop.eup %3223  ;;  %v2008_v22 = vmul.f32 1.442695, %v1947_v20  ;;  %2062 = vadd.xlane.f32.xlu0 %v4277_v57 }
 0x3f6   : > { %3233 = vpow2.f32 %v2010_v49  ;;  %2068 = vadd.xlane.f32.xlu1 %v4279_v32  ;;  %v1917_v37 = vpop.xlane.xlu1 %1916 }
 0x3f7   : > { %3235 = vpow2.f32 %v2008_v22  ;;  %v1949_v15 = vsub.f32 %v4165_v42, %v1917_v37 }
 0x3f8   : > { %v4284_v44 = vpop.eup %3225 }
 0x3f9   : > { %v4286_v60 = vpop.eup %3227  ;;  %v2012_v30 = vmul.f32 1.442695, %v1949_v15  ;;  %2042 = vadd.xlane.f32.xlu0 %v4284_v44 }
 0x3fa   : > { %2064 = vadd.xlane.f32.xlu1 %v4286_v60 }
 0x3fb   : > { %3237 = vpow2.f32 %v2012_v30 }
 0x3fc   : > { %v4290_v63 = vpop.eup %3229 }
 0x3fd   : > { %v4292_v45 = vpop.eup %3231  ;;  %2070 = vadd.xlane.f32.xlu0 %v4290_v63 }
 0x3fe   : > { %2044 = vadd.xlane.f32.xlu1 %v4292_v45 }
 0x400   : > { %v4296_v46 = vpop.eup %3233 }
 0x401   : > { %v4298_v42 = vpop.eup %3235  ;;  %2074 = vadd.xlane.f32.xlu0 %v4296_v46 }
 0x402   : > { %2072 = vadd.xlane.f32.xlu1 %v4298_v42 }
 0x405   : > { %v4302_v43 = vpop.eup %3237 }
 0x406   : > { %2076 = vadd.xlane.f32.xlu1 %v4302_v43 }
 0x42e   : > { %v2019_v14 = vpop.xlane.xlu0 %2018 }
 0x430   : > { %v2021_v38 = vpop.xlane.xlu1 %2020 }
 0x431   : > { %3239 = vrcp.f32 %v2021_v38 }
 0x432   : > { %v2015_v27 = vpop.xlane.xlu0 %2014 }
 0x433   : > { %3241 = vrcp.f32 %v2015_v27 }
 0x434   : > { %3243 = vrcp.f32 %v2019_v14 }
 0x436   : > { %v2017_v29 = vpop.xlane.xlu1 %2016 }
 0x437   : > { %3245 = vrcp.f32 %v2017_v29 }
 0x43a   : > { %v2027_v58 = vpop.xlane.xlu0 %2026  ;;  %v2029_v7 = vpop.xlane.xlu1 %2028 }
 0x43b   : > { %3247 = vrcp.f32 %v2027_v58  ;;  %v3240_v28 = vpop.eup %3239 }
 0x43c   : > { %3249 = vrcp.f32 %v2029_v7  ;;  %v2113_v10 = vmul.f32 %v3240_v28, %v4187_v41 }
 0x43d   : > { %v3242_v25 = vpop.eup %3241 }
 0x43e   : > { %v2023_v52 = vpop.xlane.xlu0 %2022  ;;  %v2025_v54 = vpop.xlane.xlu1 %2024  ;;  %v2110_v47 = vmul.f32 %v3242_v25, %v4191_v6 }
 0x43f   : > { %3251 = vrcp.f32 %v2023_v52  ;;  %v3244_v5 = vpop.eup %3243 }
 0x440   : > { %3253 = vrcp.f32 %v2025_v54  ;;  %v2112_v2 = vmul.f32 %v3244_v5, %v4183_v21 }
 0x441   : > { %v3246_v8 = vpop.eup %3245 }
 0x442   : > { %v2035_v36 = vpop.xlane.xlu0 %2034  ;;  %v2037_v35 = vpop.xlane.xlu1 %2036  ;;  %v2111_v9 = vmul.f32 %v3246_v8, %v4196_v62  ;;  %v2143_v48 = vpack.c.bf16 %v2113_v10, %v2112_v2 }
 0x443   : > { %3255 = vrcp.f32 %v2035_v36 }
 0x444   : > { %v2142_v4 = vpack.c.bf16 %v2111_v9, %v2110_v47  ;;  %3257 = vrcp.f32 %v2037_v35 }
 0x445   : > { %v3248_v13 = vpop.eup %3247 }
 0x446   : > { %v2031_v34 = vpop.xlane.xlu0 %2030  ;;  %2900 = vmatprep.mubr.bf16.mxu0 %v2142_v4  ;;  %v2033_v53 = vpop.xlane.xlu1 %2032  ;;  %v2116_v21 = vmul.f32 %v3248_v13, %v4203_v61 }
 0x447   : > { %v3250_v50 = vpop.eup %3249  ;;  %3259 = vrcp.f32 %v2031_v34  ;;  %2901 = vmatmul.mubr.bf16.vlgmr.msra.gmra.mrb[64].mxu0 %v2143_v48 }
 0x448   : > { %3261 = vrcp.f32 %v2033_v53  ;;  %v2117_v20 = vmul.f32 %v3250_v50, %v4201_v40 }
 0x449   : > { %v3252_v41 = vpop.eup %3251 }
 0x44a   : > { %v3254_v24 = vpop.eup %3253  ;;  %v2039_v59 = vpop.xlane.xlu0 %2038  ;;  %v2114_v62 = vmul.f32 %v3252_v41, %v4211_v0  ;;  %v2145_v15 = vpack.c.bf16 %v2117_v20, %v2116_v21 }
 0x44b   : > { %v2041_v6 = vpop.xlane.xlu1 %2040  ;;  %3263 = vrcp.f32 %v2039_v59  ;;  %v2115_v49 = vmul.f32 %v3254_v24, %v4209_v26 }
 0x44c   : > { %3265 = vrcp.f32 %v2041_v6 }
 0x44d   : > { %v2144_v22 = vpack.c.bf16 %v2115_v49, %v2114_v62  ;;  %v3256_v37 = vpop.eup %3255 }
 0x44e   : > { %v3258_v30 = vpop.eup %3257  ;;  %v2120_v0 = vmul.f32 %v3256_v37, %v4217_v1 }
 0x44f   : > { %2904 = vmatprep.mubr.bf16.mxu0 %v2144_v22  ;;  %v2121_v61 = vmul.f32 %v3258_v30, %v4215_v39 }
 0x450   : > { %2905 = vmatmul.mubr.bf16.gmra.mrb[68].mxu0 %v2145_v15 }
 0x451   : > { %v3260_v14 = vpop.eup %3259  ;;  %v2147_v7 = vpack.c.bf16 %v2121_v61, %v2120_v0 }
 0x452   : > { %v3262_v38 = vpop.eup %3261  ;;  %v2118_v27 = vmul.f32 %v3260_v14, %v4223_v17 }
 0x453   : > { %v2119_v40 = vmul.f32 %v3262_v38, %v4221_v19 }
 0x455   : > { %v3264_v29 = vpop.eup %3263  ;;  %v2146_v58 = vpack.c.bf16 %v2119_v40, %v2118_v27 }
 0x456   : > { %v3266_v26 = vpop.eup %3265  ;;  %v2122_v28 = vmul.f32 %v3264_v29, %v4229_v3 }
 0x457   : > { %2908 = vmatprep.mubr.bf16.mxu0 %v2146_v58  ;;  %v2123_v52 = vmul.f32 %v3266_v26, %v4227_v11 }
 0x458   : > { %2909 = vmatmul.mubr.bf16.gmra.mrb[72].mxu0 %v2147_v7 }
 0x459   : > { %v2148_v54 = vpack.c.bf16 %v2123_v52, %v2122_v28 }
 0x45b   : > { %2912 = vmatprep.mubr.bf16.mxu0 %v2148_v54 }
 0x46e   : > { %v2051_v25 = vpop.xlane.xlu0 %2050 }
 0x472   : > { %v2047_v17 = vpop.xlane.xlu0 %2046 }
 0x473   : > { %v2053_v5 = vpop.xlane.xlu1 %2052 }
 0x474   : > { %3267 = vrcp.f32 %v2053_v5 }
 0x475   : > { %3269 = vrcp.f32 %v2047_v17 }
 0x476   : > { %v2059_v39 = vpop.xlane.xlu0 %2058  ;;  %3271 = vrcp.f32 %v2051_v25 }
 0x477   : > { %v2049_v1 = vpop.xlane.xlu1 %2048 }
 0x478   : > { %3273 = vrcp.f32 %v2049_v1 }
 0x47a   : > { %v2055_v19 = vpop.xlane.xlu0 %2054 }
 0x47b   : > { %v2061_v8 = vpop.xlane.xlu1 %2060 }
 0x47c   : > { %3275 = vrcp.f32 %v2061_v8 }
 0x47d   : > { %3277 = vrcp.f32 %v2055_v19 }
 0x47e   : > { %v2067_v3 = vpop.xlane.xlu0 %2066  ;;  %v3268_v10 = vpop.eup %3267  ;;  %3279 = vrcp.f32 %v2059_v39 }
 0x47f   : > { %v2057_v11 = vpop.xlane.xlu1 %2056  ;;  %v3270_v36 = vpop.eup %3269  ;;  %v2129_v9 = vmul.f32 %v3268_v10, %v4247_v51 }
 0x480   : > { %3281 = vrcp.f32 %v2057_v11  ;;  %v3272_v35 = vpop.eup %3271  ;;  %v2126_v48 = vmul.f32 %v3270_v36, %v4245_v12 }
 0x481   : > { %v2128_v34 = vmul.f32 %v3272_v35, %v4240_v31 }
 0x482   : > { %v3274_v47 = vpop.eup %3273  ;;  %v2063_v2 = vpop.xlane.xlu0 %2062 }
 0x483   : > { %v2069_v4 = vpop.xlane.xlu1 %2068  ;;  %v2127_v13 = vmul.f32 %v3274_v47, %v4255_v16  ;;  %v2151_v41 = vpack.c.bf16 %v2129_v9, %v2128_v34 }
 0x484   : > { %3283 = vrcp.f32 %v2069_v4 }
 0x485   : > { %v2150_v53 = vpack.c.bf16 %v2127_v13, %v2126_v48  ;;  %3285 = vrcp.f32 %v2063_v2 }
 0x486   : > { %v2043_v50 = vpop.xlane.xlu0 %2042  ;;  %v3276_v24 = vpop.eup %3275  ;;  %3287 = vrcp.f32 %v2067_v3 }
 0x487   : > { %2932 = vmatprep.mubr.bf16.mxu1 %v2150_v53  ;;  %v2065_v59 = vpop.xlane.xlu1 %2064  ;;  %v3278_v6 = vpop.eup %3277  ;;  %v2133_v16 = vmul.f32 %v3276_v24, %v4263_v23 }
 0x488   : > { %3289 = vrcp.f32 %v2065_v59  ;;  %2933 = vmatmul.mubr.bf16.vlgmr.msra.gmra.mrb[128].mxu1 %v2151_v41  ;;  %v3280_v51 = vpop.eup %3279  ;;  %v2130_v31 = vmul.f32 %v3278_v6, %v4261_v33 }
 0x489   : > { %3291 = vrcp.f32 %v2043_v50  ;;  %v2132_v49 = vmul.f32 %v3280_v51, %v4253_v56 }
 0x48a   : > { %v3282_v62 = vpop.eup %3281  ;;  %v2071_v12 = vpop.xlane.xlu0 %2070 }
 0x48b   : > { %v2045_v21 = vpop.xlane.xlu1 %2044  ;;  %v2131_v20 = vmul.f32 %v3282_v62, %v4271_v18  ;;  %v2153_v37 = vpack.c.bf16 %v2133_v16, %v2132_v49 }
 0x48c   : > { %3293 = vrcp.f32 %v2045_v21 }
 0x48d   : > { %v2152_v22 = vpack.c.bf16 %v2131_v20, %v2130_v31  ;;  %3295 = vrcp.f32 %v2071_v12 }
 0x48e   : > { %v3284_v15 = vpop.eup %3283  ;;  %v2075_v30 = vpop.xlane.xlu0 %2074 }
 0x48f   : > { %2936 = vmatprep.mubr.bf16.mxu1 %v2152_v22  ;;  %v2073_v14 = vpop.xlane.xlu1 %2072  ;;  %v3286_v38 = vpop.eup %3285  ;;  %v2137_v33 = vmul.f32 %v3284_v15, %v4279_v32 }
 0x490   : > { %3297 = vrcp.f32 %v2073_v14  ;;  %2937 = vmatmul.mubr.bf16.gmra.mrb[132].mxu1 %v2153_v37  ;;  %v3288_v27 = vpop.eup %3287  ;;  %v2134_v18 = vmul.f32 %v3286_v38, %v4277_v57 }
 0x491   : > { %3299 = vrcp.f32 %v2075_v30  ;;  %v2136_v40 = vmul.f32 %v3288_v27, %v4269_v55 }
 0x492   : > { %v3290_v23 = vpop.eup %3289 }
 0x493   : > { %v2077_v0 = vpop.xlane.xlu1 %2076  ;;  %v2135_v56 = vmul.f32 %v3290_v23, %v4286_v60  ;;  %v3292_v61 = vpop.eup %3291  ;;  %v2155_v26 = vpack.c.bf16 %v2137_v33, %v2136_v40 }
 0x494   : > { %3301 = vrcp.f32 %v2077_v0  ;;  %v2124_v7 = vmul.f32 %v3292_v61, %v4284_v44 }
 0x495   : > { %v2154_v29 = vpack.c.bf16 %v2135_v56, %v2134_v18 }
 0x496   : > { %v3294_v58 = vpop.eup %3293 }
 0x497   : > { %2940 = vmatprep.mubr.bf16.mxu1 %v2154_v29  ;;  %v2125_v28 = vmul.f32 %v3294_v58, %v4292_v45  ;;  %v3296_v52 = vpop.eup %3295 }
 0x498   : > { %2941 = vmatmul.mubr.bf16.gmra.mrb[136].mxu1 %v2155_v26  ;;  %v2138_v57 = vmul.f32 %v3296_v52, %v4290_v63 }
 0x499   : > { %v2149_v32 = vpack.c.bf16 %v2125_v28, %v2124_v7 }
 0x49a   : > { %v3298_v54 = vpop.eup %3297 }
 0x49b   : > { %2913 = vmatmul.mubr.bf16.gmra.mrb[76].mxu0 %v2149_v32  ;;  %v2139_v60 = vmul.f32 %v3298_v54, %v4298_v42  ;;  %v3300_v25 = vpop.eup %3299 }
 0x49c   : > { %v2140_v5 = vmul.f32 %v3300_v25, %v4296_v46 }
 0x49d   : > { %v2156_v55 = vpack.c.bf16 %v2139_v60, %v2138_v57 }
 0x49e   : > { %v3302_v17 = vpop.eup %3301 }
 0x49f   : > { %2944 = vmatprep.mubr.bf16.mxu1 %v2156_v55  ;;  %v2141_v44 = vmul.f32 %v3302_v17, %v4302_v43 }
 0x4a1   : > { %v2157_v39 = vpack.c.bf16 %v2141_v44, %v2140_v5 }
 0x4a3   : > { %2945 = vmatmul.mubr.bf16.gmra.mrb[140].mxu1 %v2157_v39 }
 0x51a   : > { %v2902_v45 = vpop.f32.mrb[64].mxu0 }
 0x51b   : > { %2354 = vst [vmem:[%s4338_s17 + $0x10] sm:$0xff] %v2902_v45  ;;  %v2192_v63 = vpop.f32.mrb[65].mxu0 }
 0x51c   : > { %2352 = vst [vmem:[%s4338_s17] sm:$0xff] %v2192_v63  ;;  %v2903_v46 = vpop.f32.mrb[66].mxu0 }
 0x51d   : > { %2355 = vst [vmem:[%s4338_s17 + $0x18] sm:$0xff] %v2903_v46  ;;  %v2195_v42 = vpop.f32.mrb[67].mxu0 }
 0x51e   : > { %2353 = vst [vmem:[%s4338_s17 + $0x8] sm:$0xff] %v2195_v42 }
 0x523   : > { %v2906_v43 = vpop.f32.mrb[68].mxu0 }
 0x524   : > { %2358 = vst [vmem:[%s4338_s17 + $0x30] sm:$0xff] %v2906_v43  ;;  %v2208_v1 = vpop.f32.mrb[69].mxu0 }
 0x525   : > { %2356 = vst [vmem:[%s4338_s17 + $0x20] sm:$0xff] %v2208_v1  ;;  %v2907_v19 = vpop.f32.mrb[70].mxu0 }
 0x526   : > { %2359 = vst [vmem:[%s4338_s17 + $0x38] sm:$0xff] %v2907_v19  ;;  %v2211_v8 = vpop.f32.mrb[71].mxu0 }
 0x527   : > { %2357 = vst [vmem:[%s4338_s17 + $0x28] sm:$0xff] %v2211_v8 }
 0x52b   : > { %v2910_v3 = vpop.f32.mrb[72].mxu0 }
 0x52c   : > { %2362 = vst [vmem:[%s4338_s17 + $0x50] sm:$0xff] %v2910_v3  ;;  %v2224_v10 = vpop.f32.mrb[73].mxu0 }
 0x52d   : > { %2360 = vst [vmem:[%s4338_s17 + $0x40] sm:$0xff] %v2224_v10  ;;  %v2911_v11 = vpop.f32.mrb[74].mxu0 }
 0x52e   : > { %2363 = vst [vmem:[%s4338_s17 + $0x58] sm:$0xff] %v2911_v11  ;;  %v2227_v36 = vpop.f32.mrb[75].mxu0 }
 0x52f   : > { %2361 = vst [vmem:[%s4338_s17 + $0x48] sm:$0xff] %v2227_v36 }
 0x55b   : > { %v2934_v35 = vpop.f32.mrb[128].mxu1 }
 0x55c   : > { %2370 = vst [vmem:[%s4338_s17 + $0x90] sm:$0xff] %v2934_v35  ;;  %v2289_v47 = vpop.f32.mrb[129].mxu1 }
 0x55d   : > { %2368 = vst [vmem:[%s4338_s17 + $0x80] sm:$0xff] %v2289_v47  ;;  %v2935_v9 = vpop.f32.mrb[130].mxu1 }
 0x55e   : > { %2371 = vst [vmem:[%s4338_s17 + $0x98] sm:$0xff] %v2935_v9  ;;  %v2292_v2 = vpop.f32.mrb[131].mxu1 }
 0x55f   : > { %2369 = vst [vmem:[%s4338_s17 + $0x88] sm:$0xff] %v2292_v2 }
 0x563   : > { %v2938_v4 = vpop.f32.mrb[132].mxu1 }
 0x564   : > { %2374 = vst [vmem:[%s4338_s17 + $0xb0] sm:$0xff] %v2938_v4  ;;  %v2305_v48 = vpop.f32.mrb[133].mxu1 }
 0x565   : > { %2372 = vst [vmem:[%s4338_s17 + $0xa0] sm:$0xff] %v2305_v48  ;;  %v2939_v13 = vpop.f32.mrb[134].mxu1 }
 0x566   : > { %2375 = vst [vmem:[%s4338_s17 + $0xb8] sm:$0xff] %v2939_v13  ;;  %v2308_v34 = vpop.f32.mrb[135].mxu1 }
 0x567   : > { %2373 = vst [vmem:[%s4338_s17 + $0xa8] sm:$0xff] %v2308_v34 }
 0x56b   : > { %v2942_v53 = vpop.f32.mrb[136].mxu1 }
 0x56c   : > { %2378 = vst [vmem:[%s4338_s17 + $0xd0] sm:$0xff] %v2942_v53  ;;  %v2321_v50 = vpop.f32.mrb[137].mxu1 }
 0x56d   : > { %2376 = vst [vmem:[%s4338_s17 + $0xc0] sm:$0xff] %v2321_v50  ;;  %v2943_v41 = vpop.f32.mrb[138].mxu1 }
 0x56e   : > { %2379 = vst [vmem:[%s4338_s17 + $0xd8] sm:$0xff] %v2943_v41  ;;  %v2914_v24 = vpop.f32.mrb[76].mxu0  ;;  %v2324_v59 = vpop.f32.mrb[139].mxu1 }
 0x56f   : > { %2366 = vst [vmem:[%s4338_s17 + $0x70] sm:$0xff] %v2914_v24  ;;  %2377 = vst [vmem:[%s4338_s17 + $0xc8] sm:$0xff] %v2324_v59  ;;  %v2240_v6 = vpop.f32.mrb[77].mxu0 }
 0x570   : > { %2364 = vst [vmem:[%s4338_s17 + $0x60] sm:$0xff] %v2240_v6  ;;  %v2915_v51 = vpop.f32.mrb[78].mxu0 }
 0x571   : > { %2367 = vst [vmem:[%s4338_s17 + $0x78] sm:$0xff] %v2915_v51  ;;  %v2243_v62 = vpop.f32.mrb[79].mxu0 }
 0x572   : > { %2365 = vst [vmem:[%s4338_s17 + $0x68] sm:$0xff] %v2243_v62 }
 0x576   : > { %v2946_v12 = vpop.f32.mrb[140].mxu1 }
 0x577   : > { %2382 = vst [vmem:[%s4338_s17 + $0xf0] sm:$0xff] %v2946_v12  ;;  %v2337_v16 = vpop.f32.mrb[141].mxu1 }
 0x578   : > { %2380 = vst [vmem:[%s4338_s17 + $0xe0] sm:$0xff] %v2337_v16  ;;  %v2947_v21 = vpop.f32.mrb[142].mxu1 }
 0x579   : > { %2383 = vst [vmem:[%s4338_s17 + $0xf8] sm:$0xff] %v2947_v21  ;;  %v2340_v31 = vpop.f32.mrb[143].mxu1 }
 0x57a   : > { %2381 = vst [vmem:[%s4338_s17 + $0xe8] sm:$0xff] %v2340_v31 }
 0x57b   : > { %3374 = shalt.err (!%p3371_p7)
}
 0x57c   : > { %s3375_s24 = scalar_lea.hbm %s4374_s4, 4096  ;;  %s3379_s26 = scalar_lea.hbm %s4425_s2, 8192 }
 0x57d   : > { %p3376_p9 = scmp.ne.s32.totalorder %s4374_s4, %s3375_s24  ;;  %p3380_p5 = scmp.lt.u32.totalorder %s4374_s4, %s4425_s2 }
 0x57e   : > { %p3381_p11 = scmp.lt.u32.totalorder %s3379_s26, %s3375_s24  ;;  %p3383_p4 = scmp.lt.u32.totalorder %s3375_s24, %s4374_s4 }
 0x57f   : > { %p3377_p2 = pnand %p3376_p9, %p3549_p12 }
 0x580   : > { %p3382_p1 = por %p3381_p11, %p3380_p5 }
 0x581   : > { %p3378_p0 = pneg %p3377_p2 }
 0x582   : > { %p3384_p6 = por %p3383_p4, %p3382_p1 }
 0x584   : > { %p3385_p8 = pnand %p3384_p6, %p3378_p0 }
 0x586   : > { %3388 = shalt.err (!%p3385_p8)
}
 0x587   : > { %s3441_s3 = smov 128   ;;  %s3442_s15 = smov 8  }
 0x588   : > { %3021 = dma.vmem_to_hbm [thread:$0]  (%p3549_p12), %s4376_s19, 4096, %s4374_s4, %s2385_s13, %s3441_s3, %s3441_s3, %s3442_s15  }
 0x589 PF: > { %s2414_s17 = sand.u32 1, %s3419_s9   ;;  %p4440_p10 = scmp.ne.s32.totalorder %s4430_s16, 0 }
 0x58a   : > { %p4441_p13 = scmp.ge.s32.totalorder %s3431_s12, 2  ;;  %s2415_s27 = scalar_lea.sflag [#allocation4], %s2414_s17 }
 0x58c   : > { %p3032_p3 = pnand %p4441_p13, %p4440_p10 }
 0x58e   : > { %3414 = dma.done.wait (!%p3032_p3), %s2415_s27, 4096  }
 0x58f   : > { %3416 = vsyncadd (!%p3032_p3), %s2415_s27, 4294963200  ;;  %p16_p7 = scmp.ge.s32.totalorder %s3514_s21, 4   ;;  %s4442_s9 = smov %s3423_s10 }
 0x590   : > { %s4443_s10 = smov %s3427_s11  ;;  %s4444_s11 = smov %s3545_s8 }
 0x591   : > { %s4445_s12 = smov %s3514_s21  ;;  %18 = sbr.rel (!%p16_p7) target bundleno = 6 (0x6), region = 77 }
 0x598   :  { %2420 = vsyncpa [#allocation3], 1 }
 0x599   :  { %2422 = vsyncpa [#allocation3 + $0x1], 1 }
 0x59a   :  { %2423 = vsyncpa [#allocation6], 1 }
 0x59b   :  { %2424 = vsyncpa [#allocation4], 1 }
 0x59c   :  { %2426 = vsyncpa [#allocation4 + $0x1], 1 }

</bundles_post_ra>
